<compile_context>
chip_gen: v6e
topology: v6e:2x2x1
jax: 0.10.0
libtpu: 0.0.40
codegen_flags: <defaults>
</compile_context>

<pallas_src>
import functools

import jax
import jax.numpy as jnp
from jax import lax
from jax.experimental import pallas as pl
from jax.experimental.pallas import tpu as pltpu

# Row layout of the packed (N, 9, D) per-layer vector table.
_LN1_G, _LN1_B, _BQ, _BK, _BV, _BO, _LN2_G, _LN2_B, _B2 = range(9)


def _layer_norm(v, g, b, eps=1e-5):
    mu = jnp.mean(v, axis=-1, keepdims=True)
    var = jnp.mean(jnp.square(v - mu), axis=-1, keepdims=True)
    return (v - mu) * lax.rsqrt(var + eps) * g + b


def _fused_kernel(H,
                  x_ref, mem_ref, mb_ref,
                  wq_ref, wk_ref, wv_ref, wo_ref, w1_ref, w2_ref,
                  vd_ref, b1_ref,
                  o_ref,
                  x_sc):
    """grid = (batch_block, layer).  The residual stream for Bblk batch rows
    persists in VMEM scratch across the (inner) layer axis."""
    layer = pl.program_id(1)

    @pl.when(layer == 0)
    def _():
        x_sc[...] = x_ref[...].astype(jnp.float32)

    x3 = x_sc[...]                       # (Bblk, Sq, D) f32 residual stream
    Bblk, Sq, D = x3.shape
    Sm = mem_ref.shape[1]
    dh = D // H
    vd = vd_ref[0]                       # (9, D) packed LN params / biases
    mb = mb_ref[...]                     # (Bblk, 1, Sm) additive key-mask bias

    def row(i):                          # (1, D) slice of the packed table
        return vd[i:i + 1, :]

    # ---- cross-attention sublayer: x + CrossAtt(LN(x), memory) ----
    h3 = _layer_norm(x3, row(_LN1_G), row(_LN1_B))
    h2 = h3.reshape(Bblk * Sq, D).astype(jnp.bfloat16)
    m2 = mem_ref[...].reshape(Bblk * Sm, D).astype(jnp.bfloat16)

    # full-width, lane-dense projections (bf16 MXU, f32 accumulate)
    q2 = jnp.dot(h2, wq_ref[0], preferred_element_type=jnp.float32) + row(_BQ)
    k2 = jnp.dot(m2, wk_ref[0], preferred_element_type=jnp.float32) + row(_BK)
    v2 = jnp.dot(m2, wv_ref[0], preferred_element_type=jnp.float32) + row(_BV)
    q2 = q2 * (1.0 / (dh ** 0.5))        # scale once on q, not per score

    q3 = q2.reshape(Bblk, Sq, D)
    k3 = k2.reshape(Bblk, Sm, D)
    v3 = v2.reshape(Bblk, Sm, D)

    # per-head scores / softmax / context (batched over the Bblk batch rows)
    ctx_heads = []
    for hi in range(H):
        lo = hi * dh
        qh = q3[:, :, lo:lo + dh].astype(jnp.bfloat16)   # (Bblk, Sq, dh)
        kh = k3[:, :, lo:lo + dh].astype(jnp.bfloat16)   # (Bblk, Sm, dh)
        vh = v3[:, :, lo:lo + dh].astype(jnp.bfloat16)   # (Bblk, Sm, dh)
        s = lax.dot_general(qh, kh, (((2,), (2,)), ((0,), (0,))),
                            preferred_element_type=jnp.float32)  # (Bblk,Sq,Sm)
        s = s + mb
        s = s - jnp.max(s, axis=-1, keepdims=True)
        p = jnp.exp(s)
        p = p * pl.reciprocal(jnp.sum(p, axis=-1, keepdims=True), approx=True)
        ctx_heads.append(
            lax.dot_general(p.astype(jnp.bfloat16), vh,
                            (((2,), (1,)), ((0,), (0,))),
                            preferred_element_type=jnp.float32))  # (Bblk,Sq,dh)
    ctx = jnp.concatenate(ctx_heads, axis=-1)            # (Bblk, Sq, D)

    # fused output projection: full-K (D) GEMM against the whole Wo
    att = jnp.dot(ctx.reshape(Bblk * Sq, D).astype(jnp.bfloat16), wo_ref[0],
                  preferred_element_type=jnp.float32) + row(_BO)
    x3 = x3 + att.reshape(Bblk, Sq, D)

    # ---- feed-forward sublayer: x + W2(ReLU(W1 LN(x))) ----
    f = _layer_norm(x3, row(_LN2_G), row(_LN2_B))
    f = jnp.dot(f.reshape(Bblk * Sq, D).astype(jnp.bfloat16), w1_ref[0],
                preferred_element_type=jnp.float32) + b1_ref[0]
    f = jnp.maximum(f, 0.0)
    f = jnp.dot(f.astype(jnp.bfloat16), w2_ref[0],
                preferred_element_type=jnp.float32) + row(_B2)
    x3 = x3 + f.reshape(Bblk, Sq, D)

    x_sc[...] = x3

    @pl.when(layer == pl.num_programs(1) - 1)
    def _():
        o_ref[...] = x3.astype(o_ref.dtype)


def _pick_block(n, cap):
    """Largest divisor of n that is <= cap."""
    b = max(1, min(n, cap))
    while n % b:
        b -= 1
    return b


def _vmem_limit_bytes():
    """~75% of the part's VMEM (96 MiB on 128 MiB parts, 48 MiB on v7x)."""
    try:
        cap = int(pltpu.get_tpu_info().vmem_capacity_bytes)
    except Exception:
        cap = 64 * 1024 * 1024
    return max(32 * 1024 * 1024, min(cap * 3 // 4, 112 * 1024 * 1024))


def backward_cross_attention_transformer(x, memory_x, mask, memory_mask,
                                         params, H):
    """N stacked BackwardCrossAttentionLayer blocks (eval mode), fused."""
    del mask  # TODO(synk): query-side mask unused by backward cross-attention
    B, Sq, D = x.shape
    Sm = memory_x.shape[1]
    N, _, Dff = params["w1"].shape
    assert D % H == 0

    # additive key-mask bias precomputed once: 0 where mask==1, -1e9 where 0
    mb = (memory_mask.reshape(B, 1, Sm).astype(jnp.float32) - 1.0) * 1e9

    # matmul weights streamed from HBM in bf16 (accumulation stays f32)
    wdt = jnp.bfloat16
    wq = params["wq"].astype(wdt)
    wk = params["wk"].astype(wdt)
    wv = params["wv"].astype(wdt)
    wo = params["wo"].astype(wdt)
    w1 = params["w1"].astype(wdt)
    w2 = params["w2"].astype(wdt)

    # packed per-layer vector table (lane-dense, one small DMA stream)
    vd = jnp.stack([params["ln1_g"], params["ln1_b"],
                    params["bq"], params["bk"], params["bv"], params["bo"],
                    params["ln2_g"], params["ln2_b"], params["b2"]],
                   axis=1).astype(jnp.float32)            # (N, 9, D)
    b1 = params["b1"].reshape(N, 1, Dff).astype(jnp.float32)

    Bblk = _pick_block(B, 8)   # batch rows per grid step (amortizes weight DMA)

    def per_batch(shape):
        return pl.BlockSpec(shape, lambda b, l: (b,) + (0,) * (len(shape) - 1))

    def per_layer(shape):
        return pl.BlockSpec(shape, lambda b, l: (l,) + (0,) * (len(shape) - 1))

    in_specs = [
        per_batch((Bblk, Sq, D)),       # x
        per_batch((Bblk, Sm, D)),       # memory
        per_batch((Bblk, 1, Sm)),       # additive key-mask bias
        per_layer((1, D, D)),           # Wq
        per_layer((1, D, D)),           # Wk
        per_layer((1, D, D)),           # Wv
        per_layer((1, D, D)),           # Wo
        per_layer((1, D, Dff)),         # W1
        per_layer((1, Dff, D)),         # W2
        per_layer((1, 9, D)),           # packed LN gamma/beta + biases
        per_layer((1, 1, Dff)),         # b1
    ]

    kernel = functools.partial(_fused_kernel, H)

    return pl.pallas_call(
        kernel,
        out_shape=jax.ShapeDtypeStruct((B, Sq, D), x.dtype),
        grid_spec=pltpu.PrefetchScalarGridSpec(
            num_scalar_prefetch=0,
            grid=(B // Bblk, N),
            in_specs=in_specs,
            out_specs=per_batch((Bblk, Sq, D)),
            scratch_shapes=[pltpu.VMEM((Bblk, Sq, D), jnp.float32)],
        ),
        compiler_params=pltpu.CompilerParams(
            dimension_semantics=("parallel", "arbitrary"),
            vmem_limit_bytes=_vmem_limit_bytes(),
        ),
    )(x, memory_x, mb, wq, wk, wv, wo, w1, w2, vd, b1)


def init_params(key, d_model, d_ff, N, dtype=jnp.float32):
    kq, kk, kv, ko, k1, k2 = jax.random.split(key, 6)
    s = 0.02
    return {
        "ln1_g": jnp.ones((N, d_model), dtype),
        "ln1_b": jnp.zeros((N, d_model), dtype),
        "wq": s * jax.random.normal(kq, (N, d_model, d_model), dtype),
        "bq": jnp.zeros((N, d_model), dtype),
        "wk": s * jax.random.normal(kk, (N, d_model, d_model), dtype),
        "bk": jnp.zeros((N, d_model), dtype),
        "wv": s * jax.random.normal(kv, (N, d_model, d_model), dtype),
        "bv": jnp.zeros((N, d_model), dtype),
        "wo": s * jax.random.normal(ko, (N, d_model, d_model), dtype),
        "bo": jnp.zeros((N, d_model), dtype),
        "ln2_g": jnp.ones((N, d_model), dtype),
        "ln2_b": jnp.zeros((N, d_model), dtype),
        "w1": s * jax.random.normal(k1, (N, d_model, d_ff), dtype),
        "b1": jnp.zeros((N, d_ff), dtype),
        "w2": s * jax.random.normal(k2, (N, d_ff, d_model), dtype),
        "b2": jnp.zeros((N, d_model), dtype),
    }


if __name__ == "__main__":
    d_model, dout_p, H, d_ff, N = 32, 0.1, 4, 64, 2
    B, Sq, Sm = 2, 8, 8

    key = jax.random.PRNGKey(0)
    kx, km, kp = jax.random.split(key, 3)
    x = jax.random.normal(kx, (B, Sq, d_model), jnp.float32)
    memory_x = jax.random.normal(km, (B, Sm, d_model), jnp.float32)
    mask = jnp.ones((B, 1, Sq), dtype=bool)
    memory_mask = jnp.ones((B, 1, Sm), dtype=bool).at[:, :, Sm - 2:].set(False)

    params = init_params(kp, d_model, d_ff, N)

    out = backward_cross_attention_transformer(
        x, memory_x, mask, memory_mask, params, H)
    out = jax.block_until_ready(out)
    assert out.shape == (B, Sq, d_model)
    assert bool(jnp.all(jnp.isfinite(out)))
    print("KERNEL_OK")
</pallas_src>

<mosaic_0001>
module attributes {stable_mosaic.version = 11 : i64} {
  func.func @_fused_kernel(%arg0: i32, %arg1: i32, %arg2: memref<2x8x32xf32, #tpu.memory_space<vmem>>, %arg3: memref<2x8x32xf32, #tpu.memory_space<vmem>>, %arg4: memref<2x1x8xf32, #tpu.memory_space<vmem>>, %arg5: memref<1x32x32xbf16, #tpu.memory_space<vmem>>, %arg6: memref<1x32x32xbf16, #tpu.memory_space<vmem>>, %arg7: memref<1x32x32xbf16, #tpu.memory_space<vmem>>, %arg8: memref<1x32x32xbf16, #tpu.memory_space<vmem>>, %arg9: memref<1x32x64xbf16, #tpu.memory_space<vmem>>, %arg10: memref<1x64x32xbf16, #tpu.memory_space<vmem>>, %arg11: memref<1x9x32xf32, #tpu.memory_space<vmem>>, %arg12: memref<1x1x64xf32, #tpu.memory_space<vmem>>, %arg13: memref<2x8x32xf32, #tpu.memory_space<vmem>>, %arg14: memref<2x8x32xf32, #tpu.memory_space<vmem>>) attributes {dimension_semantics = [#tpu.dimension_semantics<parallel>, #tpu.dimension_semantics<arbitrary>], iteration_bounds = array<i64: 1, 2>, scalar_prefetch = 0 : i64, scratch_operands = 1 : i64, tpu.core_type = #tpu.core_type<tc>, window_params = [{transform_indices = @transform_0, window_bounds = array<i64: 2, 8, 32>}, {transform_indices = @transform_1, window_bounds = array<i64: 2, 8, 32>}, {transform_indices = @transform_2, window_bounds = array<i64: 2, 1, 8>}, {transform_indices = @transform_3, window_bounds = array<i64: 1, 32, 32>}, {transform_indices = @transform_4, window_bounds = array<i64: 1, 32, 32>}, {transform_indices = @transform_5, window_bounds = array<i64: 1, 32, 32>}, {transform_indices = @transform_6, window_bounds = array<i64: 1, 32, 32>}, {transform_indices = @transform_7, window_bounds = array<i64: 1, 32, 64>}, {transform_indices = @transform_8, window_bounds = array<i64: 1, 64, 32>}, {transform_indices = @transform_9, window_bounds = array<i64: 1, 9, 32>}, {transform_indices = @transform_10, window_bounds = array<i64: 1, 1, 64>}, {transform_indices = @transform_11, window_bounds = array<i64: 2, 8, 32>}]} {
    %c0_i32 = arith.constant 0 : i32
    %0 = arith.cmpi eq, %arg1, %c0_i32 : i32
    %1 = arith.extui %0 : i1 to i32
    %c0_i32_0 = arith.constant 0 : i32
    %2 = arith.cmpi ne, %1, %c0_i32_0 : i32
    scf.if %2 {
      %c0_70 = arith.constant 0 : index
      %c0_71 = arith.constant 0 : index
      %c0_72 = arith.constant 0 : index
      %206 = vector.load %arg2[%c0_70, %c0_71, %c0_72] : memref<2x8x32xf32, #tpu.memory_space<vmem>>, vector<2x8x32xf32>
      %c0_73 = arith.constant 0 : index
      %c0_74 = arith.constant 0 : index
      %c0_75 = arith.constant 0 : index
      %207 = vector.load %arg14[%c0_73, %c0_74, %c0_75] : memref<2x8x32xf32, #tpu.memory_space<vmem>>, vector<2x8x32xf32>
      tpu.vector_store %arg14[%c0_73, %c0_74, %c0_75], %206 {strides = array<i32>} : memref<2x8x32xf32, #tpu.memory_space<vmem>>, vector<2x8x32xf32>,
    } else {
    }
    %c0 = arith.constant 0 : index
    %c0_1 = arith.constant 0 : index
    %c0_2 = arith.constant 0 : index
    %3 = vector.load %arg14[%c0, %c0_1, %c0_2] : memref<2x8x32xf32, #tpu.memory_space<vmem>>, vector<2x8x32xf32>
    %c0_3 = arith.constant 0 : index
    %c0_4 = arith.constant 0 : index
    %c0_5 = arith.constant 0 : index
    %4 = vector.load %arg11[%c0_3, %c0_4, %c0_5] : memref<1x9x32xf32, #tpu.memory_space<vmem>>, vector<1x9x32xf32>
    %5 = vector.shape_cast %4 : vector<1x9x32xf32> to vector<9x32xf32>
    %c0_6 = arith.constant 0 : index
    %c0_7 = arith.constant 0 : index
    %c0_8 = arith.constant 0 : index
    %6 = vector.load %arg4[%c0_6, %c0_7, %c0_8] : memref<2x1x8xf32, #tpu.memory_space<vmem>>, vector<2x1x8xf32>
    %7 = vector.extract_strided_slice %5 {offsets = [0, 0], sizes = [1, 32], strides = [1, 1]} : vector<9x32xf32> to vector<1x32xf32>
    %8 = vector.extract_strided_slice %5 {offsets = [1, 0], sizes = [1, 32], strides = [1, 1]} : vector<9x32xf32> to vector<1x32xf32>
    %cst = arith.constant dense<0.000000e+00> : vector<2x8xf32>
    %9 = vector.multi_reduction <add>, %3, %cst [2] : vector<2x8x32xf32> to vector<2x8xf32>
    %10 = vector.shape_cast %9 : vector<2x8xf32> to vector<2x8x1xf32>
    %cst_9 = arith.constant 3.200000e+01 : f32
    %11 = vector.broadcast %cst_9 : f32 to vector<2x8x1xf32>
    %12 = arith.divf %10, %11 : vector<2x8x1xf32>
    %13 = vector.broadcast %12 : vector<2x8x1xf32> to vector<2x8x32xf32>
    %14 = arith.subf %3, %13 : vector<2x8x32xf32>
    %15 = arith.mulf %14, %14 : vector<2x8x32xf32>
    %cst_10 = arith.constant dense<0.000000e+00> : vector<2x8xf32>
    %16 = vector.multi_reduction <add>, %15, %cst_10 [2] : vector<2x8x32xf32> to vector<2x8xf32>
    %17 = vector.shape_cast %16 : vector<2x8xf32> to vector<2x8x1xf32>
    %cst_11 = arith.constant 3.200000e+01 : f32
    %18 = vector.broadcast %cst_11 : f32 to vector<2x8x1xf32>
    %19 = arith.divf %17, %18 : vector<2x8x1xf32>
    %20 = vector.broadcast %12 : vector<2x8x1xf32> to vector<2x8x32xf32>
    %21 = arith.subf %3, %20 : vector<2x8x32xf32>
    %cst_12 = arith.constant 9.99999974E-6 : f32
    %22 = vector.broadcast %cst_12 : f32 to vector<2x8x1xf32>
    %23 = arith.addf %19, %22 : vector<2x8x1xf32>
    %24 = math.rsqrt %23 : vector<2x8x1xf32>
    %25 = vector.broadcast %24 : vector<2x8x1xf32> to vector<2x8x32xf32>
    %26 = arith.mulf %21, %25 : vector<2x8x32xf32>
    %27 = vector.shape_cast %7 : vector<1x32xf32> to vector<1x1x32xf32>
    %28 = vector.broadcast %27 : vector<1x1x32xf32> to vector<2x8x32xf32>
    %29 = arith.mulf %26, %28 : vector<2x8x32xf32>
    %30 = vector.shape_cast %8 : vector<1x32xf32> to vector<1x1x32xf32>
    %31 = vector.broadcast %30 : vector<1x1x32xf32> to vector<2x8x32xf32>
    %32 = arith.addf %29, %31 : vector<2x8x32xf32>
    %33 = vector.shape_cast %32 : vector<2x8x32xf32> to vector<16x32xf32>
    %34 = arith.truncf %33 : vector<16x32xf32> to vector<16x32xbf16>
    %c0_13 = arith.constant 0 : index
    %c0_14 = arith.constant 0 : index
    %c0_15 = arith.constant 0 : index
    %35 = vector.load %arg3[%c0_13, %c0_14, %c0_15] : memref<2x8x32xf32, #tpu.memory_space<vmem>>, vector<2x8x32xf32>
    %36 = vector.shape_cast %35 : vector<2x8x32xf32> to vector<16x32xf32>
    %37 = arith.truncf %36 : vector<16x32xf32> to vector<16x32xbf16>
    %c0_16 = arith.constant 0 : index
    %c0_17 = arith.constant 0 : index
    %c0_18 = arith.constant 0 : index
    %38 = vector.load %arg5[%c0_16, %c0_17, %c0_18] : memref<1x32x32xbf16, #tpu.memory_space<vmem>>, vector<1x32x32xbf16>
    %39 = vector.shape_cast %38 : vector<1x32x32xbf16> to vector<32x32xbf16>
    %cst_19 = arith.constant dense<0.000000e+00> : vector<16x32xf32>
    %40 = tpu.matmul %34, %39, %cst_19 {dimension_numbers = #tpu.dot_dimension_numbers<[1], [0], [0], [1], [0, 0, 1, 1], [], []>} : vector<16x32xbf16>, vector<32x32xbf16>, vector<16x32xf32> -> vector<16x32xf32>
    %41 = vector.extract_strided_slice %5 {offsets = [2, 0], sizes = [1, 32], strides = [1, 1]} : vector<9x32xf32> to vector<1x32xf32>
    %42 = vector.broadcast %41 : vector<1x32xf32> to vector<16x32xf32>
    %43 = arith.addf %40, %42 : vector<16x32xf32>
    %c0_20 = arith.constant 0 : index
    %c0_21 = arith.constant 0 : index
    %c0_22 = arith.constant 0 : index
    %44 = vector.load %arg6[%c0_20, %c0_21, %c0_22] : memref<1x32x32xbf16, #tpu.memory_space<vmem>>, vector<1x32x32xbf16>
    %45 = vector.shape_cast %44 : vector<1x32x32xbf16> to vector<32x32xbf16>
    %cst_23 = arith.constant dense<0.000000e+00> : vector<16x32xf32>
    %46 = tpu.matmul %37, %45, %cst_23 {dimension_numbers = #tpu.dot_dimension_numbers<[1], [0], [0], [1], [0, 0, 1, 1], [], []>} : vector<16x32xbf16>, vector<32x32xbf16>, vector<16x32xf32> -> vector<16x32xf32>
    %47 = vector.extract_strided_slice %5 {offsets = [3, 0], sizes = [1, 32], strides = [1, 1]} : vector<9x32xf32> to vector<1x32xf32>
    %48 = vector.broadcast %47 : vector<1x32xf32> to vector<16x32xf32>
    %49 = arith.addf %46, %48 : vector<16x32xf32>
    %c0_24 = arith.constant 0 : index
    %c0_25 = arith.constant 0 : index
    %c0_26 = arith.constant 0 : index
    %50 = vector.load %arg7[%c0_24, %c0_25, %c0_26] : memref<1x32x32xbf16, #tpu.memory_space<vmem>>, vector<1x32x32xbf16>
    %51 = vector.shape_cast %50 : vector<1x32x32xbf16> to vector<32x32xbf16>
    %cst_27 = arith.constant dense<0.000000e+00> : vector<16x32xf32>
    %52 = tpu.matmul %37, %51, %cst_27 {dimension_numbers = #tpu.dot_dimension_numbers<[1], [0], [0], [1], [0, 0, 1, 1], [], []>} : vector<16x32xbf16>, vector<32x32xbf16>, vector<16x32xf32> -> vector<16x32xf32>
    %53 = vector.extract_strided_slice %5 {offsets = [4, 0], sizes = [1, 32], strides = [1, 1]} : vector<9x32xf32> to vector<1x32xf32>
    %54 = vector.broadcast %53 : vector<1x32xf32> to vector<16x32xf32>
    %55 = arith.addf %52, %54 : vector<16x32xf32>
    %cst_28 = arith.constant 0.353553385 : f32
    %56 = vector.broadcast %cst_28 : f32 to vector<16x32xf32>
    %57 = arith.mulf %43, %56 : vector<16x32xf32>
    %58 = vector.shape_cast %57 : vector<16x32xf32> to vector<2x8x32xf32>
    %59 = vector.shape_cast %49 : vector<16x32xf32> to vector<2x8x32xf32>
    %60 = vector.shape_cast %55 : vector<16x32xf32> to vector<2x8x32xf32>
    %61 = vector.extract_strided_slice %58 {offsets = [0, 0, 0], sizes = [2, 8, 8], strides = [1, 1, 1]} : vector<2x8x32xf32> to vector<2x8x8xf32>
    %62 = arith.truncf %61 : vector<2x8x8xf32> to vector<2x8x8xbf16>
    %63 = vector.extract_strided_slice %59 {offsets = [0, 0, 0], sizes = [2, 8, 8], strides = [1, 1, 1]} : vector<2x8x32xf32> to vector<2x8x8xf32>
    %64 = arith.truncf %63 : vector<2x8x8xf32> to vector<2x8x8xbf16>
    %65 = vector.extract_strided_slice %60 {offsets = [0, 0, 0], sizes = [2, 8, 8], strides = [1, 1, 1]} : vector<2x8x32xf32> to vector<2x8x8xf32>
    %66 = arith.truncf %65 : vector<2x8x8xf32> to vector<2x8x8xbf16>
    %cst_29 = arith.constant dense<0.000000e+00> : vector<2x8x8xf32>
    %67 = tpu.matmul %62, %64, %cst_29 {dimension_numbers = #tpu.dot_dimension_numbers<[2], [2], [1], [1], [0, 0, 0, 1, 1, 1], [0], [0]>} : vector<2x8x8xbf16>, vector<2x8x8xbf16>, vector<2x8x8xf32> -> vector<2x8x8xf32>
    %68 = vector.broadcast %6 : vector<2x1x8xf32> to vector<2x8x8xf32>
    %69 = arith.addf %67, %68 : vector<2x8x8xf32>
    %cst_30 = arith.constant dense<0xFF800000> : vector<2x8xf32>
    %70 = vector.multi_reduction <maximumf>, %69, %cst_30 [2] : vector<2x8x8xf32> to vector<2x8xf32>
    %71 = vector.shape_cast %70 : vector<2x8xf32> to vector<2x8x1xf32>
    %72 = vector.broadcast %71 : vector<2x8x1xf32> to vector<2x8x8xf32>
    %73 = arith.subf %69, %72 : vector<2x8x8xf32>
    %74 = math.exp %73 : vector<2x8x8xf32>
    %cst_31 = arith.constant dense<0.000000e+00> : vector<2x8xf32>
    %75 = vector.multi_reduction <add>, %74, %cst_31 [2] : vector<2x8x8xf32> to vector<2x8xf32>
    %76 = vector.shape_cast %75 : vector<2x8xf32> to vector<2x8x1xf32>
    %77 = tpu.reciprocal %76 {approx = true} : vector<2x8x1xf32> -> vector<2x8x1xf32>
    %78 = vector.broadcast %77 : vector<2x8x1xf32> to vector<2x8x8xf32>
    %79 = arith.mulf %74, %78 : vector<2x8x8xf32>
    %80 = arith.truncf %79 : vector<2x8x8xf32> to vector<2x8x8xbf16>
    %cst_32 = arith.constant dense<0.000000e+00> : vector<2x8x8xf32>
    %81 = tpu.matmul %80, %66, %cst_32 {dimension_numbers = #tpu.dot_dimension_numbers<[2], [1], [1], [2], [0, 0, 0, 1, 1, 2], [0], [0]>} : vector<2x8x8xbf16>, vector<2x8x8xbf16>, vector<2x8x8xf32> -> vector<2x8x8xf32>
    %82 = vector.extract_strided_slice %58 {offsets = [0, 0, 8], sizes = [2, 8, 8], strides = [1, 1, 1]} : vector<2x8x32xf32> to vector<2x8x8xf32>
    %83 = arith.truncf %82 : vector<2x8x8xf32> to vector<2x8x8xbf16>
    %84 = vector.extract_strided_slice %59 {offsets = [0, 0, 8], sizes = [2, 8, 8], strides = [1, 1, 1]} : vector<2x8x32xf32> to vector<2x8x8xf32>
    %85 = arith.truncf %84 : vector<2x8x8xf32> to vector<2x8x8xbf16>
    %86 = vector.extract_strided_slice %60 {offsets = [0, 0, 8], sizes = [2, 8, 8], strides = [1, 1, 1]} : vector<2x8x32xf32> to vector<2x8x8xf32>
    %87 = arith.truncf %86 : vector<2x8x8xf32> to vector<2x8x8xbf16>
    %cst_33 = arith.constant dense<0.000000e+00> : vector<2x8x8xf32>
    %88 = tpu.matmul %83, %85, %cst_33 {dimension_numbers = #tpu.dot_dimension_numbers<[2], [2], [1], [1], [0, 0, 0, 1, 1, 1], [0], [0]>} : vector<2x8x8xbf16>, vector<2x8x8xbf16>, vector<2x8x8xf32> -> vector<2x8x8xf32>
    %89 = vector.broadcast %6 : vector<2x1x8xf32> to vector<2x8x8xf32>
    %90 = arith.addf %88, %89 : vector<2x8x8xf32>
    %cst_34 = arith.constant dense<0xFF800000> : vector<2x8xf32>
    %91 = vector.multi_reduction <maximumf>, %90, %cst_34 [2] : vector<2x8x8xf32> to vector<2x8xf32>
    %92 = vector.shape_cast %91 : vector<2x8xf32> to vector<2x8x1xf32>
    %93 = vector.broadcast %92 : vector<2x8x1xf32> to vector<2x8x8xf32>
    %94 = arith.subf %90, %93 : vector<2x8x8xf32>
    %95 = math.exp %94 : vector<2x8x8xf32>
    %cst_35 = arith.constant dense<0.000000e+00> : vector<2x8xf32>
    %96 = vector.multi_reduction <add>, %95, %cst_35 [2] : vector<2x8x8xf32> to vector<2x8xf32>
    %97 = vector.shape_cast %96 : vector<2x8xf32> to vector<2x8x1xf32>
    %98 = tpu.reciprocal %97 {approx = true} : vector<2x8x1xf32> -> vector<2x8x1xf32>
    %99 = vector.broadcast %98 : vector<2x8x1xf32> to vector<2x8x8xf32>
    %100 = arith.mulf %95, %99 : vector<2x8x8xf32>
    %101 = arith.truncf %100 : vector<2x8x8xf32> to vector<2x8x8xbf16>
    %cst_36 = arith.constant dense<0.000000e+00> : vector<2x8x8xf32>
    %102 = tpu.matmul %101, %87, %cst_36 {dimension_numbers = #tpu.dot_dimension_numbers<[2], [1], [1], [2], [0, 0, 0, 1, 1, 2], [0], [0]>} : vector<2x8x8xbf16>, vector<2x8x8xbf16>, vector<2x8x8xf32> -> vector<2x8x8xf32>
    %103 = vector.extract_strided_slice %58 {offsets = [0, 0, 16], sizes = [2, 8, 8], strides = [1, 1, 1]} : vector<2x8x32xf32> to vector<2x8x8xf32>
    %104 = arith.truncf %103 : vector<2x8x8xf32> to vector<2x8x8xbf16>
    %105 = vector.extract_strided_slice %59 {offsets = [0, 0, 16], sizes = [2, 8, 8], strides = [1, 1, 1]} : vector<2x8x32xf32> to vector<2x8x8xf32>
    %106 = arith.truncf %105 : vector<2x8x8xf32> to vector<2x8x8xbf16>
    %107 = vector.extract_strided_slice %60 {offsets = [0, 0, 16], sizes = [2, 8, 8], strides = [1, 1, 1]} : vector<2x8x32xf32> to vector<2x8x8xf32>
    %108 = arith.truncf %107 : vector<2x8x8xf32> to vector<2x8x8xbf16>
    %cst_37 = arith.constant dense<0.000000e+00> : vector<2x8x8xf32>
    %109 = tpu.matmul %104, %106, %cst_37 {dimension_numbers = #tpu.dot_dimension_numbers<[2], [2], [1], [1], [0, 0, 0, 1, 1, 1], [0], [0]>} : vector<2x8x8xbf16>, vector<2x8x8xbf16>, vector<2x8x8xf32> -> vector<2x8x8xf32>
    %110 = vector.broadcast %6 : vector<2x1x8xf32> to vector<2x8x8xf32>
    %111 = arith.addf %109, %110 : vector<2x8x8xf32>
    %cst_38 = arith.constant dense<0xFF800000> : vector<2x8xf32>
    %112 = vector.multi_reduction <maximumf>, %111, %cst_38 [2] : vector<2x8x8xf32> to vector<2x8xf32>
    %113 = vector.shape_cast %112 : vector<2x8xf32> to vector<2x8x1xf32>
    %114 = vector.broadcast %113 : vector<2x8x1xf32> to vector<2x8x8xf32>
    %115 = arith.subf %111, %114 : vector<2x8x8xf32>
    %116 = math.exp %115 : vector<2x8x8xf32>
    %cst_39 = arith.constant dense<0.000000e+00> : vector<2x8xf32>
    %117 = vector.multi_reduction <add>, %116, %cst_39 [2] : vector<2x8x8xf32> to vector<2x8xf32>
    %118 = vector.shape_cast %117 : vector<2x8xf32> to vector<2x8x1xf32>
    %119 = tpu.reciprocal %118 {approx = true} : vector<2x8x1xf32> -> vector<2x8x1xf32>
    %120 = vector.broadcast %119 : vector<2x8x1xf32> to vector<2x8x8xf32>
    %121 = arith.mulf %116, %120 : vector<2x8x8xf32>
    %122 = arith.truncf %121 : vector<2x8x8xf32> to vector<2x8x8xbf16>
    %cst_40 = arith.constant dense<0.000000e+00> : vector<2x8x8xf32>
    %123 = tpu.matmul %122, %108, %cst_40 {dimension_numbers = #tpu.dot_dimension_numbers<[2], [1], [1], [2], [0, 0, 0, 1, 1, 2], [0], [0]>} : vector<2x8x8xbf16>, vector<2x8x8xbf16>, vector<2x8x8xf32> -> vector<2x8x8xf32>
    %124 = vector.extract_strided_slice %58 {offsets = [0, 0, 24], sizes = [2, 8, 8], strides = [1, 1, 1]} : vector<2x8x32xf32> to vector<2x8x8xf32>
    %125 = arith.truncf %124 : vector<2x8x8xf32> to vector<2x8x8xbf16>
    %126 = vector.extract_strided_slice %59 {offsets = [0, 0, 24], sizes = [2, 8, 8], strides = [1, 1, 1]} : vector<2x8x32xf32> to vector<2x8x8xf32>
    %127 = arith.truncf %126 : vector<2x8x8xf32> to vector<2x8x8xbf16>
    %128 = vector.extract_strided_slice %60 {offsets = [0, 0, 24], sizes = [2, 8, 8], strides = [1, 1, 1]} : vector<2x8x32xf32> to vector<2x8x8xf32>
    %129 = arith.truncf %128 : vector<2x8x8xf32> to vector<2x8x8xbf16>
    %cst_41 = arith.constant dense<0.000000e+00> : vector<2x8x8xf32>
    %130 = tpu.matmul %125, %127, %cst_41 {dimension_numbers = #tpu.dot_dimension_numbers<[2], [2], [1], [1], [0, 0, 0, 1, 1, 1], [0], [0]>} : vector<2x8x8xbf16>, vector<2x8x8xbf16>, vector<2x8x8xf32> -> vector<2x8x8xf32>
    %131 = vector.broadcast %6 : vector<2x1x8xf32> to vector<2x8x8xf32>
    %132 = arith.addf %130, %131 : vector<2x8x8xf32>
    %cst_42 = arith.constant dense<0xFF800000> : vector<2x8xf32>
    %133 = vector.multi_reduction <maximumf>, %132, %cst_42 [2] : vector<2x8x8xf32> to vector<2x8xf32>
    %134 = vector.shape_cast %133 : vector<2x8xf32> to vector<2x8x1xf32>
    %135 = vector.broadcast %134 : vector<2x8x1xf32> to vector<2x8x8xf32>
    %136 = arith.subf %132, %135 : vector<2x8x8xf32>
    %137 = math.exp %136 : vector<2x8x8xf32>
    %cst_43 = arith.constant dense<0.000000e+00> : vector<2x8xf32>
    %138 = vector.multi_reduction <add>, %137, %cst_43 [2] : vector<2x8x8xf32> to vector<2x8xf32>
    %139 = vector.shape_cast %138 : vector<2x8xf32> to vector<2x8x1xf32>
    %140 = tpu.reciprocal %139 {approx = true} : vector<2x8x1xf32> -> vector<2x8x1xf32>
    %141 = vector.broadcast %140 : vector<2x8x1xf32> to vector<2x8x8xf32>
    %142 = arith.mulf %137, %141 : vector<2x8x8xf32>
    %143 = arith.truncf %142 : vector<2x8x8xf32> to vector<2x8x8xbf16>
    %cst_44 = arith.constant dense<0.000000e+00> : vector<2x8x8xf32>
    %144 = tpu.matmul %143, %129, %cst_44 {dimension_numbers = #tpu.dot_dimension_numbers<[2], [1], [1], [2], [0, 0, 0, 1, 1, 2], [0], [0]>} : vector<2x8x8xbf16>, vector<2x8x8xbf16>, vector<2x8x8xf32> -> vector<2x8x8xf32>
    %145 = tpu.concatenate %81, %102, %123, %144 in 2 : vector<2x8x8xf32>, vector<2x8x8xf32>, vector<2x8x8xf32>, vector<2x8x8xf32> -> vector<2x8x32xf32>
    %146 = vector.shape_cast %145 : vector<2x8x32xf32> to vector<16x32xf32>
    %147 = arith.truncf %146 : vector<16x32xf32> to vector<16x32xbf16>
    %c0_45 = arith.constant 0 : index
    %c0_46 = arith.constant 0 : index
    %c0_47 = arith.constant 0 : index
    %148 = vector.load %arg8[%c0_45, %c0_46, %c0_47] : memref<1x32x32xbf16, #tpu.memory_space<vmem>>, vector<1x32x32xbf16>
    %149 = vector.shape_cast %148 : vector<1x32x32xbf16> to vector<32x32xbf16>
    %cst_48 = arith.constant dense<0.000000e+00> : vector<16x32xf32>
    %150 = tpu.matmul %147, %149, %cst_48 {dimension_numbers = #tpu.dot_dimension_numbers<[1], [0], [0], [1], [0, 0, 1, 1], [], []>} : vector<16x32xbf16>, vector<32x32xbf16>, vector<16x32xf32> -> vector<16x32xf32>
    %151 = vector.extract_strided_slice %5 {offsets = [5, 0], sizes = [1, 32], strides = [1, 1]} : vector<9x32xf32> to vector<1x32xf32>
    %152 = vector.broadcast %151 : vector<1x32xf32> to vector<16x32xf32>
    %153 = arith.addf %150, %152 : vector<16x32xf32>
    %154 = vector.shape_cast %153 : vector<16x32xf32> to vector<2x8x32xf32>
    %155 = arith.addf %3, %154 : vector<2x8x32xf32>
    %156 = vector.extract_strided_slice %5 {offsets = [6, 0], sizes = [1, 32], strides = [1, 1]} : vector<9x32xf32> to vector<1x32xf32>
    %157 = vector.extract_strided_slice %5 {offsets = [7, 0], sizes = [1, 32], strides = [1, 1]} : vector<9x32xf32> to vector<1x32xf32>
    %cst_49 = arith.constant dense<0.000000e+00> : vector<2x8xf32>
    %158 = vector.multi_reduction <add>, %155, %cst_49 [2] : vector<2x8x32xf32> to vector<2x8xf32>
    %159 = vector.shape_cast %158 : vector<2x8xf32> to vector<2x8x1xf32>
    %cst_50 = arith.constant 3.200000e+01 : f32
    %160 = vector.broadcast %cst_50 : f32 to vector<2x8x1xf32>
    %161 = arith.divf %159, %160 : vector<2x8x1xf32>
    %162 = vector.broadcast %161 : vector<2x8x1xf32> to vector<2x8x32xf32>
    %163 = arith.subf %155, %162 : vector<2x8x32xf32>
    %164 = arith.mulf %163, %163 : vector<2x8x32xf32>
    %cst_51 = arith.constant dense<0.000000e+00> : vector<2x8xf32>
    %165 = vector.multi_reduction <add>, %164, %cst_51 [2] : vector<2x8x32xf32> to vector<2x8xf32>
    %166 = vector.shape_cast %165 : vector<2x8xf32> to vector<2x8x1xf32>
    %cst_52 = arith.constant 3.200000e+01 : f32
    %167 = vector.broadcast %cst_52 : f32 to vector<2x8x1xf32>
    %168 = arith.divf %166, %167 : vector<2x8x1xf32>
    %169 = vector.broadcast %161 : vector<2x8x1xf32> to vector<2x8x32xf32>
    %170 = arith.subf %155, %169 : vector<2x8x32xf32>
    %cst_53 = arith.constant 9.99999974E-6 : f32
    %171 = vector.broadcast %cst_53 : f32 to vector<2x8x1xf32>
    %172 = arith.addf %168, %171 : vector<2x8x1xf32>
    %173 = math.rsqrt %172 : vector<2x8x1xf32>
    %174 = vector.broadcast %173 : vector<2x8x1xf32> to vector<2x8x32xf32>
    %175 = arith.mulf %170, %174 : vector<2x8x32xf32>
    %176 = vector.shape_cast %156 : vector<1x32xf32> to vector<1x1x32xf32>
    %177 = vector.broadcast %176 : vector<1x1x32xf32> to vector<2x8x32xf32>
    %178 = arith.mulf %175, %177 : vector<2x8x32xf32>
    %179 = vector.shape_cast %157 : vector<1x32xf32> to vector<1x1x32xf32>
    %180 = vector.broadcast %179 : vector<1x1x32xf32> to vector<2x8x32xf32>
    %181 = arith.addf %178, %180 : vector<2x8x32xf32>
    %182 = vector.shape_cast %181 : vector<2x8x32xf32> to vector<16x32xf32>
    %183 = arith.truncf %182 : vector<16x32xf32> to vector<16x32xbf16>
    %c0_54 = arith.constant 0 : index
    %c0_55 = arith.constant 0 : index
    %c0_56 = arith.constant 0 : index
    %184 = vector.load %arg9[%c0_54, %c0_55, %c0_56] : memref<1x32x64xbf16, #tpu.memory_space<vmem>>, vector<1x32x64xbf16>
    %185 = vector.shape_cast %184 : vector<1x32x64xbf16> to vector<32x64xbf16>
    %cst_57 = arith.constant dense<0.000000e+00> : vector<16x64xf32>
    %186 = tpu.matmul %183, %185, %cst_57 {dimension_numbers = #tpu.dot_dimension_numbers<[1], [0], [0], [1], [0, 0, 1, 1], [], []>} : vector<16x32xbf16>, vector<32x64xbf16>, vector<16x64xf32> -> vector<16x64xf32>
    %c0_58 = arith.constant 0 : index
    %c0_59 = arith.constant 0 : index
    %c0_60 = arith.constant 0 : index
    %187 = vector.load %arg12[%c0_58, %c0_59, %c0_60] : memref<1x1x64xf32, #tpu.memory_space<vmem>>, vector<1x1x64xf32>
    %188 = vector.shape_cast %187 : vector<1x1x64xf32> to vector<1x64xf32>
    %189 = vector.broadcast %188 : vector<1x64xf32> to vector<16x64xf32>
    %190 = arith.addf %186, %189 : vector<16x64xf32>
    %cst_61 = arith.constant 0.000000e+00 : f32
    %191 = vector.broadcast %cst_61 : f32 to vector<16x64xf32>
    %192 = arith.maximumf %190, %191 : vector<16x64xf32>
    %193 = arith.truncf %192 : vector<16x64xf32> to vector<16x64xbf16>
    %c0_62 = arith.constant 0 : index
    %c0_63 = arith.constant 0 : index
    %c0_64 = arith.constant 0 : index
    %194 = vector.load %arg10[%c0_62, %c0_63, %c0_64] : memref<1x64x32xbf16, #tpu.memory_space<vmem>>, vector<1x64x32xbf16>
    %195 = vector.shape_cast %194 : vector<1x64x32xbf16> to vector<64x32xbf16>
    %cst_65 = arith.constant dense<0.000000e+00> : vector<16x32xf32>
    %196 = tpu.matmul %193, %195, %cst_65 {dimension_numbers = #tpu.dot_dimension_numbers<[1], [0], [0], [1], [0, 0, 1, 1], [], []>} : vector<16x64xbf16>, vector<64x32xbf16>, vector<16x32xf32> -> vector<16x32xf32>
    %197 = vector.extract_strided_slice %5 {offsets = [8, 0], sizes = [1, 32], strides = [1, 1]} : vector<9x32xf32> to vector<1x32xf32>
    %198 = vector.broadcast %197 : vector<1x32xf32> to vector<16x32xf32>
    %199 = arith.addf %196, %198 : vector<16x32xf32>
    %200 = vector.shape_cast %199 : vector<16x32xf32> to vector<2x8x32xf32>
    %201 = arith.addf %155, %200 : vector<2x8x32xf32>
    %c0_66 = arith.constant 0 : index
    %c0_67 = arith.constant 0 : index
    %c0_68 = arith.constant 0 : index
    %202 = vector.load %arg14[%c0_66, %c0_67, %c0_68] : memref<2x8x32xf32, #tpu.memory_space<vmem>>, vector<2x8x32xf32>
    tpu.vector_store %arg14[%c0_66, %c0_67, %c0_68], %201 {strides = array<i32>} : memref<2x8x32xf32, #tpu.memory_space<vmem>>, vector<2x8x32xf32>,
    %c1_i32 = arith.constant 1 : i32
    %203 = arith.cmpi eq, %arg1, %c1_i32 : i32
    %204 = arith.extui %203 : i1 to i32
    %c0_i32_69 = arith.constant 0 : i32
    %205 = arith.cmpi ne, %204, %c0_i32_69 : i32
    scf.if %205 {
      %c0_70 = arith.constant 0 : index
      %c0_71 = arith.constant 0 : index
      %c0_72 = arith.constant 0 : index
      %206 = vector.load %arg13[%c0_70, %c0_71, %c0_72] : memref<2x8x32xf32, #tpu.memory_space<vmem>>, vector<2x8x32xf32>
      tpu.vector_store %arg13[%c0_70, %c0_71, %c0_72], %201 {strides = array<i32>} : memref<2x8x32xf32, #tpu.memory_space<vmem>>, vector<2x8x32xf32>,
    } else {
    }
    return
  }
  func.func @transform_0(%arg0: i32, %arg1: i32) -> (i32, i32, i32) {
    %c0_i32 = arith.constant 0 : i32
    %c0_i32_0 = arith.constant 0 : i32
    %c0_i32_1 = arith.constant 0 : i32
    return %arg0, %c0_i32, %c0_i32_0 : i32, i32, i32
  }
  func.func @transform_1(%arg0: i32, %arg1: i32) -> (i32, i32, i32) {
    %c0_i32 = arith.constant 0 : i32
    %c0_i32_0 = arith.constant 0 : i32
    %c0_i32_1 = arith.constant 0 : i32
    return %arg0, %c0_i32, %c0_i32_0 : i32, i32, i32
  }
  func.func @transform_2(%arg0: i32, %arg1: i32) -> (i32, i32, i32) {
    %c0_i32 = arith.constant 0 : i32
    %c0_i32_0 = arith.constant 0 : i32
    %c0_i32_1 = arith.constant 0 : i32
    return %arg0, %c0_i32, %c0_i32_0 : i32, i32, i32
  }
  func.func @transform_3(%arg0: i32, %arg1: i32) -> (i32, i32, i32) {
    %c0_i32 = arith.constant 0 : i32
    %c0_i32_0 = arith.constant 0 : i32
    %c0_i32_1 = arith.constant 0 : i32
    return %arg1, %c0_i32, %c0_i32_0 : i32, i32, i32
  }
  func.func @transform_4(%arg0: i32, %arg1: i32) -> (i32, i32, i32) {
    %c0_i32 = arith.constant 0 : i32
    %c0_i32_0 = arith.constant 0 : i32
    %c0_i32_1 = arith.constant 0 : i32
    return %arg1, %c0_i32, %c0_i32_0 : i32, i32, i32
  }
  func.func @transform_5(%arg0: i32, %arg1: i32) -> (i32, i32, i32) {
    %c0_i32 = arith.constant 0 : i32
    %c0_i32_0 = arith.constant 0 : i32
    %c0_i32_1 = arith.constant 0 : i32
    return %arg1, %c0_i32, %c0_i32_0 : i32, i32, i32
  }
  func.func @transform_6(%arg0: i32, %arg1: i32) -> (i32, i32, i32) {
    %c0_i32 = arith.constant 0 : i32
    %c0_i32_0 = arith.constant 0 : i32
    %c0_i32_1 = arith.constant 0 : i32
    return %arg1, %c0_i32, %c0_i32_0 : i32, i32, i32
  }
  func.func @transform_7(%arg0: i32, %arg1: i32) -> (i32, i32, i32) {
    %c0_i32 = arith.constant 0 : i32
    %c0_i32_0 = arith.constant 0 : i32
    %c0_i32_1 = arith.constant 0 : i32
    return %arg1, %c0_i32, %c0_i32_0 : i32, i32, i32
  }
  func.func @transform_8(%arg0: i32, %arg1: i32) -> (i32, i32, i32) {
    %c0_i32 = arith.constant 0 : i32
    %c0_i32_0 = arith.constant 0 : i32
    %c0_i32_1 = arith.constant 0 : i32
    return %arg1, %c0_i32, %c0_i32_0 : i32, i32, i32
  }
  func.func @transform_9(%arg0: i32, %arg1: i32) -> (i32, i32, i32) {
    %c0_i32 = arith.constant 0 : i32
    %c0_i32_0 = arith.constant 0 : i32
    %c0_i32_1 = arith.constant 0 : i32
    return %arg1, %c0_i32, %c0_i32_0 : i32, i32, i32
  }
  func.func @transform_10(%arg0: i32, %arg1: i32) -> (i32, i32, i32) {
    %c0_i32 = arith.constant 0 : i32
    %c0_i32_0 = arith.constant 0 : i32
    %c0_i32_1 = arith.constant 0 : i32
    return %arg1, %c0_i32, %c0_i32_0 : i32, i32, i32
  }
  func.func @transform_11(%arg0: i32, %arg1: i32) -> (i32, i32, i32) {
    %c0_i32 = arith.constant 0 : i32
    %c0_i32_0 = arith.constant 0 : i32
    %c0_i32_1 = arith.constant 0 : i32
    return %arg0, %c0_i32, %c0_i32_0 : i32, i32, i32
  }
}

</mosaic_0001>

<bundles_post_ra>
// kernel: tpu_custom_call.1
= control target key start
LH: loop header
LB: loop body
LE: loop exit
PB: predicated region body
PF: predicated region fallthrough
CT: control target
= control target key end

     0   :  { %s3473_s0 = inlined_call_operand.hbm [shape: f32[2,8,32], index: 0, kind: input, shape index: {}]   ;;  %s3474_s1 = inlined_call_operand.hbm [shape: f32[2,8,32], index: 1, kind: input, shape index: {}]   ;;  %s3475_s2 = inlined_call_operand.hbm [shape: f32[2,1,8], index: 2, kind: input, shape index: {}]   ;;  %s3476_s3 = inlined_call_operand.vmem [shape: bf16[2,32,32], index: 3, kind: input, shape index: {}]   ;;  %s3477_s4 = inlined_call_operand.vmem [shape: bf16[2,32,32], index: 4, kind: input, shape index: {}]   ;;  %s3478_s5 = inlined_call_operand.vmem [shape: bf16[2,32,32], index: 5, kind: input, shape index: {}]   ;;  %s3479_s6 = inlined_call_operand.vmem [shape: bf16[2,32,32], index: 6, kind: input, shape index: {}]   ;;  %s3480_s7 = inlined_call_operand.hbm [shape: bf16[2,32,64], index: 7, kind: input, shape index: {}]   ;;  %s3481_s8 = inlined_call_operand.vmem [shape: bf16[2,64,32], index: 8, kind: input, shape index: {}]   ;;  %s3482_s9 = inlined_call_operand.vmem [shape: f32[2,9,32], index: 9, kind: input, shape index: {}]   ;;  %s3483_s10 = inlined_call_operand.vmem [shape: f32[2,1,64], index: 10, kind: input, shape index: {}]   ;;  %s3484_s11 = inlined_call_operand.hbm [shape: f32[2,8,32], index: 11, kind: output, shape index: {}]  }
   0x1   :  { %3490 = sst [smem:[#allocation17_spill]] %s3473_s0 }
   0x2   :  { %3491 = sst [smem:[#allocation18_spill]] %s3474_s1 }
   0x3   :  { %3492 = sst [smem:[#allocation19_spill]] %s3475_s2 }
   0x4   :  { %3493 = sst [smem:[#allocation20_spill]] %s3476_s3 }
   0x5   :  { %3494 = sst [smem:[#allocation21_spill]] %s3477_s4 }
   0x6   :  { %3495 = sst [smem:[#allocation22_spill]] %s3480_s7 }
   0x7   :  { %3496 = sst [smem:[#allocation23_spill]] %s3484_s11 }
   0x8   :  { %16 = vsyncpa [#allocation4], 0 }
   0x9   :  { %17 = vsyncpa [#allocation7], 0 }
   0xa   :  { %18 = vsyncpa [#allocation10], 0 }
   0xb   :  { %20 = vsyncpa [#allocation10 + $0x1], 0 }
   0xc   :  { %21 = vsyncpa [#allocation5], 0  ;;  %s2981_s17 = smov 0   ;;  %s2983_s18 = smov 0  }
   0xd   :  { %s2985_s19 = smov 0   ;;  %s2987_s20 = smov 0  }
   0xe   :  { %s2989_s21 = smov 0   ;;  %s2991_s22 = smov 0  }
   0xf LB: > { %s3485_s23 = sadd.s32 4294967295, %s2899_s22   ;;  %p241_p0 = scmp.ne.s32.totalorder %s2883_s18, %s2879_s17  ;;  %s2899_s22 = sphi %s2991_s22, %s27_s22   ;;  %s2895_s21 = sphi %s2989_s21, %s3521_s21   ;;  %s2891_s20 = sphi %s2987_s20, %s3520_s20   ;;  %s2887_s19 = sphi %s2985_s19, %s3519_s19   ;;  %s2883_s18 = sphi %s2983_s18, %s3518_s18   ;;  %s2879_s17 = sphi %s2981_s17, %s3517_s17  }
  0x10   : > { %p3013_p1 = scmp.eq.s32.totalorder %s3485_s23, 0  ;;  %p2252_p2 = scmp.ge.s32.totalorder %s2899_s22, 1 }
  0x11   : > { %p356_p3 = scmp.lt.s32.totalorder %s2899_s22, 3  ;;  %s2901_s27 = smov [#allocation6]  }
  0x12   : > { %s3497_s24 = scalar_select %p3013_p1, 1, 0 }
  0x13   : > { %p3021_p4 = por %p3013_p1, %p241_p0  ;;  %p3025_p5 = pnand %p2252_p2, %p356_p3 }
  0x14   : > { %s387_s28 = sshll.u32 %s2901_s27, 4  ;;  %s2902_s30 = smov [#allocation3]   ;;  %s388_s28 = int_to_ptr.vmem [resolvable:$true] %s387_s28 }
  0x15   : > { %s3498_s25 = scalar_select %p3021_p4, 1, 0 }
  0x16   : > { %p2548_p6 = pneg %p3025_p5  ;;  %s371_s12 = sshll.u32 %s2902_s30, 4  ;;  %s372_s12 = int_to_ptr.vmem [resolvable:$true] %s371_s12 }
  0x17   : > { %s2718_s13 = scalar_lea.vmem %s388_s28, 256  ;;  %p2726_p12 = scmp.lt.s32.totalorder %s388_s28, %s388_s28 }
  0x18   : > { %p3033_p7 = pnand %p2548_p6, %p3013_p1  ;;  %p2719_p9 = scmp.ne.s32.totalorder %s388_s28, %s2718_s13 }
  0x19   : > { %p2727_p13 = scmp.lt.s32.totalorder %s2718_s13, %s2718_s13 }
  0x1a   : > { %p2709_p8 = pneg %p3033_p7 }
  0x1b   : > { %p2728_p0 = por %p2727_p13, %p2726_p12 }
  0x1c   : > { %p2721_p10 = pnand %p2719_p9, %p2709_p8 }
  0x1e   : > { %p2722_p11 = pneg %p2721_p10 }
  0x20   : > { %p2729_p2 = pnand %p2728_p0, %p2722_p11 }
  0x22   : > { %2732 = shalt.err (!%p2729_p2)
}
  0x23   : > { %s2903_s14 = smov 128   ;;  %s2904_s15 = smov 8  }
  0x24   : > { %s3501_s1 = sld [smem:[#allocation18_spill]]  ;;  %s2905_s27 = smov [#allocation8]  }
  0x25   : > { %s403_s30 = sshll.u32 %s2905_s27, 4  ;;  %s2744_s23 = scalar_lea.vmem %s372_s12, 256  ;;  %s404_s30 = int_to_ptr.vmem [resolvable:$true] %s403_s30 }
  0x26   : > { %p2745_p3 = scmp.ne.s32.totalorder %s372_s12, %s2744_s23  ;;  %p2752_p10 = scmp.lt.s32.totalorder %s372_s12, %s372_s12 }
  0x27   : > { %p2753_p11 = scmp.lt.s32.totalorder %s2744_s23, %s2744_s23 }
  0x28   : > { %p2747_p6 = pnand %p2745_p3, %p2709_p8 }
  0x29   : > { %p2754_p12 = por %p2753_p11, %p2752_p10 }
  0x2a   : > { %2554 = dma.hbm_to_vmem [thread:$0]  (!%p3033_p7), %s3501_s1, 256, %s388_s28, [#allocation7], %s2903_s14, %s2903_s14, %s2904_s15  }
  0x2b   : > { %p2748_p9 = pneg %p2747_p6 }
  0x2d   : > { %p2755_p13 = pnand %p2754_p12, %p2748_p9 }
  0x2f   : > { %2758 = shalt.err (!%p2755_p13)
}
  0x30   : > { %s3502_s0 = sld [smem:[#allocation17_spill]]  ;;  %s2770_s28 = scalar_lea.vmem %s404_s30, 32 }
  0x31   : > { %p2771_p0 = scmp.ne.s32.totalorder %s404_s30, %s2770_s28  ;;  %p2778_p6 = scmp.lt.s32.totalorder %s404_s30, %s404_s30 }
  0x32   : > { %p2779_p4 = scmp.lt.s32.totalorder %s2770_s28, %s2770_s28 }
  0x33   : > { %p2773_p2 = pnand %p2771_p0, %p2709_p8 }
  0x34   : > { %p2780_p1 = por %p2779_p4, %p2778_p6 }
  0x35   : > { %p2774_p3 = pneg %p2773_p2 }
  0x36   : > { %2551 = dma.hbm_to_vmem [thread:$0]  (!%p3033_p7), %s3502_s0, 256, %s372_s12, [#allocation4], %s2903_s14, %s2903_s14, %s2904_s15  }
  0x37   : > { %p2781_p10 = pnand %p2780_p1, %p2774_p3 }
  0x39   : > { %2784 = shalt.err (!%p2781_p10)
}
  0x3a   : > { %s2906_s23 = smov 16   ;;  %s2907_s11 = smov 1  }
  0x3b   : > { %s3503_s2 = sld [smem:[#allocation19_spill]]  ;;  %s228_s15 = sadd.s32 1, %s2887_s19 }
  0x3c   : > { %s36_s16 = sadd.s32 1, %s2895_s21  ;;  %p235_p1 = scmp.ne.s32.totalorder %s2887_s19, %s2883_s18 }
  0x3d   : > { %p37_p4 = scmp.ge.s32.totalorder %s36_s16, 2  ;;  %p236_p8 = scmp.eq.s32.totalorder %s2899_s22, 0 }
  0x3e   : > { %p2565_p9 = scmp.lt.s32.totalorder %s2899_s22, 2  ;;  %s449_s17 = sand.u32 1, %s2887_s19  }
  0x3f   : > { %s3523_s16 = smov (%p37_p4, %s36_s16), 0  ;;  %p237_p11 = por %p236_p8, %p235_p1 }
  0x40   : > { %3504 = sst [smem:[#allocation16_spill]] %s3523_s16  ;;  %s225_s27 = ssub.s32 %s2895_s21, %s3523_s16 }
  0x41   : > { %2557 = dma.hbm_to_vmem [thread:$0]  (!%p3033_p7), %s3503_s2, 32, %s404_s30, [#allocation7], %s2906_s23, %s2906_s23, %s2907_s11  }
  0x42   : > { %s2257_s13 = sshll.u32 %s449_s17, 4  ;;  %p226_p12 = scmp.eq.s32.totalorder %s225_s27, 0 }
  0x43   : > { %s2323_s29 = sshll.u32 %s2895_s21, 8  ;;  %s453_s28 = scalar_lea.vmem [#allocation9], %s2257_s13 }
  0x44   : > { %s460_s12 = sshll.u32 %s453_s28, 4  ;;  %s3505_s7 = sld [smem:[#allocation22_spill]]  ;;  %s461_s12 = int_to_ptr.vmem [resolvable:$true] %s460_s12 }
  0x45   : > { %s3076_s30 = scalar_select %p226_p12, %s2887_s19, %s228_s15  }
  0x46   : > { %p3083_p7 = pnand %p2565_p9, %p237_p11  ;;  %s450_s1 = scalar_lea.sflag [#allocation10], %s449_s17 }
  0x47   : > { %s2798_s27 = scalar_lea.vmem %s461_s12, 256  ;;  %s2908_s15 = smov [#allocation9]  }
  0x48   : > { %p2787_p13 = pneg %p3083_p7  ;;  %p2799_p0 = scmp.ne.s32.totalorder %s461_s12, %s2798_s27 }
  0x49   : > { %s2803_s13 = sshll.u32 %s2908_s15, 4  ;;  %s2804_s13 = int_to_ptr.vmem [resolvable:$false] %s2803_s13 }
  0x4a   : > { %s459_s14 = scalar_lea.hbm %s3505_s7, %s2323_s29  ;;  %p2801_p2 = pnand %p2799_p0, %p2787_p13 }
  0x4b   : > { %s2805_s28 = scalar_lea.vmem %s2804_s13, 512  ;;  %p2806_p6 = scmp.lt.s32.totalorder %s461_s12, %s2804_s13 }
  0x4c   : > { %p2802_p3 = pneg %p2801_p2  ;;  %p2807_p10 = scmp.lt.s32.totalorder %s2805_s28, %s2798_s27 }
  0x4e   : > { %p2808_p1 = por %p2807_p10, %p2806_p6 }
  0x50   : > { %p2809_p4 = pnand %p2808_p1, %p2802_p3 }
  0x52   : > { %2812 = shalt.err (!%p2809_p4)
}
  0x53   : > { %s2909_s29 = smov 64   ;;  %s2910_s23 = smov 4  }
  0x54   : > { %2561 = dma.hbm_to_vmem [thread:$0]  (!%p3083_p7), %s459_s14, 256, %s461_s12, %s450_s1, %s2909_s29, %s2909_s29, %s2910_s23  }
  0x55   : > { %494 = sbr.rel (%p3025_p5) target bundleno = 3948 (0xf6c), region = 64  ;;  %p3507_p8 = scmp.ne.s32.totalorder (!%p3025_p5), %s3497_s24, 0 }
  0x5a   : > { %2862 = dma.done.wait (%p3507_p8), [#allocation4], 256  }
  0x5b   : > { %2864 = vsyncadd (%p3507_p8), [#allocation4], 4294967040 }
  0x5c   : > { %2866 = dma.done.wait (%p3507_p8), [#allocation7], 288  }
  0x5d   : > { %2868 = vsyncadd (%p3507_p8), [#allocation7], 4294967008  ;;  %s508_s17 = sand.u32 1, %s2883_s18   ;;  %p3508_p5 = scmp.ne.s32.totalorder %s3498_s25, 0 }
  0x5e   : > { %s3102_s0 = sshll.u32 %s508_s17, 4  ;;  %s509_s1 = scalar_lea.sflag [#allocation10], %s508_s17 }
  0x5f   : > { %2870 = dma.done.wait (%p3508_p5), %s509_s1, 256  }
  0x60   : > { %2872 = vsyncadd (%p3508_p5), %s509_s1, 4294967040  ;;  %p582_p9 = scmp.lt.s32.totalorder %s2891_s20, 1  ;;  %s3509_s3 = sld [smem:[#allocation20_spill]] }
  0x61   : > { %s3510_s4 = sld [smem:[#allocation21_spill]]  ;;  %p2277_p11 = scmp.ne.s32.totalorder %s2891_s20, 0 }
  0x62   : > { %s3111_s12 = scalar_select %p582_p9, %s2891_s20, 1 }
  0x64   : > { %s2324_s24 = sshll.u32 %s3111_s12, 4  ;;  %s2328_s11 = sshll.u32 %s3111_s12, 5 }
  0x65   : > { %s3128_s17 = scalar_lea.vmem %s3478_s5, %s2324_s24  ;;  %s3133_s2 = scalar_lea.vmem %s3479_s6, %s2324_s24 }
  0x66   : > { %s3118_s15 = scalar_lea.vmem %s3509_s3, %s2324_s24  ;;  %s3138_s14 = scalar_lea.vmem %s3481_s8, %s2328_s11 }
  0x67   : > { %s3123_s25 = scalar_lea.vmem %s3510_s4, %s2324_s24  ;;  %s3143_s13 = scalar_lea.vmem %s3482_s9, %s2324_s24 }
  0x68   : > { %s614_s29 = scalar_lea.vmem %s3483_s10, %s3111_s12  ;;  %620 = sbr.rel (%p2277_p11) target bundleno = 111 (0x6f), region = 84 }
  0x6d   : > { %v621_v0 = vld [vmem:[#allocation3] sm:$0xff]  ;;  %vm623_vm0 = vcmask 261120   ;;  %v622_v1 = vld [vmem:[#allocation3 + $0x8] sm:$0xff] }
  0x6e   : > { %624 = vst.msk [vmem:[#allocation2] sm:$0xff] %vm623_vm0, %v621_v0  ;;  %625 = vst.msk [vmem:[#allocation2 + $0x8] sm:$0xff] %vm623_vm0, %v622_v1 }
  0x6f PF: > { %vm632_vm1 = vcmask 261120   ;;  %v2653_v16 = vld [vmem:[%s3123_s25 + $0x8] sm:$0xff]   ;;  %v2911_v17 = vmov 0.0   ;;  %vm2912_vm2 = vmmov 0   ;;  %v2654_v19 = vld [vmem:[%s3123_s25] sm:$0xff]   ;;  %v660_v30 = vlaneseq  ;;  %s2913_s3 = smov 120  }
  0x70   : > { %2390 = vmatprep.subr.bf16.mxu1 %v2911_v17  ;;  %2394 = vmatprep.mubr.msk.bf16.mxu1 %vm2912_vm2, %v2911_v17  ;;  %v2655_v18 = vld [vmem:[%s3118_s15 + $0x8] sm:$0xff]   ;;  %v673_v20 = vld [vmem:[#allocation6] sm:$0xff]  ;;  %vm885_vm3 = vcmask 64512   ;;  %vm1005_vm4 = vcmask 1043456   ;;  %s2914_s4 = smov 112   ;;  %s2915_s7 = smov 104  }
  0x71   : > { %2391 = vmatpush3.bf16.msra.mxu1 %v2653_v16  ;;  %v674_v21 = vld [vmem:[#allocation6 + $0x8] sm:$0xff]  ;;  %2382 = vmatprep.subr.bf16.mxu0 %v2911_v17  ;;  %v2656_v22 = vld [vmem:[%s3118_s15] sm:$0xff]   ;;  %v3179_v31 = vshrl.u32 %v660_v30, 7  ;;  %s2916_s16 = smov 8   ;;  %s2917_s26 = smov 16   ;;  %vm1787_vm5 = vcmask 130048  }
  0x72   : > { %2392 = vmatprep.subr.bf16.mxu1 %v2911_v17  ;;  %2383 = vmatpush3.bf16.msra.mxu0 %v2655_v18  ;;  %v675_v23 = vpack.c.bf16 %v674_v21, %v673_v20  ;;  %v3183_v33 = vld [vmem:[%s3143_s13] sm:$0xff]  ;;  %v2657_v45 = vld [vmem:[%s3128_s17 + $0x8] sm:$0xff]   ;;  %s2918_s24 = smov 24   ;;  %vm1790_vm6 = vcmask 195584   ;;  %vm2005_vm7 = vcmask 523264   ;;  %p2318_p12 = scmp.ne.s32.totalorder %s2891_s20, 1 }
  0x73   : > { %2384 = vmatprep.subr.bf16.mxu0 %v2911_v17  ;;  %2386 = vmatprep.mubr.msk.bf16.mxu0 %vm2912_vm2, %v2911_v17  ;;  %v662_v32 = vsub.s32 0, %v3179_v31  ;;  %v668_v37 = vsub.s32 1, %v3179_v31  ;;  %v2658_v47 = vld [vmem:[%s3128_s17] sm:$0xff]   ;;  %v746_v48 = vsub.s32 3, %v3179_v31  ;;  %v682_v60 = vsub.s32 2, %v3179_v31 }
  0x75   : > { %v3150_v2 = vld [vmem:[#allocation2] sm:$0xff]  ;;  %v3152_v3 = vld [vmem:[#allocation2 + $0x8] sm:$0xff]  ;;  %2393 = vmatpush3.bf16.msra.mxu1 %v2654_v19  ;;  %v663_v36 = vrot.slane %v3183_v33, %v662_v32  ;;  %v669_v41 = vrot.slane %v3183_v33, %v668_v37  ;;  %v747_v49 = vrot.slane %v3183_v33, %v746_v48  ;;  %v683_v61 = vrot.slane %v3183_v33, %v682_v60 }
  0x76   : > { %v633_v4 = vsel %vm632_vm1, %v3150_v2, 0.0  ;;  %v636_v5 = vsel %vm632_vm1, %v3152_v3, 0.0  ;;  %2385 = vmatpush3.bf16.msra.mxu0 %v2656_v22  ;;  %2406 = vmatprep.subr.bf16.mxu1 %v2911_v17 }
  0x77   : > { %634 = vadd.xlane.f32.xlu0 %v633_v4  ;;  %2398 = vmatprep.subr.bf16.mxu0 %v2911_v17 }
  0x78   : > { %2395 = vmatmul.mubr.msk.bf16.vlgmr.msra.gmra.mxu1 %vm632_vm1, %v675_v23 }
  0x79   : > { %2408 = vmatprep.mubr.msk.bf16.mxu1 %vm2912_vm2, %v2911_v17 }
  0x7b   : > { %637 = vadd.xlane.f32.xlu0 %v636_v5 }
 0x100   : > { %v635_v6 = vpop.xlane.xlu0 %634 }
 0x101   : > { %v640_v7 = vmul.f32 0.03125, %v635_v6 }
 0x103   : > { %v642_v8 = vsub.f32 %v3150_v2, %v640_v7 }
 0x104   : > { %v638_v9 = vpop.xlane.xlu0 %637 }
 0x105   : > { %v641_v10 = vmul.f32 0.03125, %v638_v9  ;;  %v644_v11 = vmul.f32 %v642_v8, %v642_v8 }
 0x107   : > { %v643_v12 = vsub.f32 %v3152_v3, %v641_v10  ;;  %v646_v13 = vsel %vm632_vm1, %v644_v11, 0.0 }
 0x108   : > { %647 = vadd.xlane.f32.xlu1 %v646_v13 }
 0x109   : > { %v645_v14 = vmul.f32 %v643_v12, %v643_v12 }
 0x10b   : > { %v649_v15 = vsel %vm632_vm1, %v645_v14, 0.0  ;;  %v810_v14 = vsub.s32 4, %v3179_v31 }
 0x10c   : > { %650 = vadd.xlane.f32.xlu1 %v649_v15 }
 0x10d   : > { %v811_v15 = vrot.slane %v3183_v33, %v810_v14 }
 0x138   : > { %v797_v50 = vpop.f32.mrf.mxu1 }
 0x139   : > { %v798_v51 = vadd.f32 %v797_v50, %v747_v49 }
 0x13a   : > { %v2396_v52 = vpop.f32.mrf.mxu1 }
 0x13b   : > { %v3200_v53 = vpack.c.bf16 %v798_v51, %v798_v51 }
 0x13c   : > { %v800_v54 = vpop.f32.mrf.mxu1 }
 0x13d   : > { %v801_v55 = vadd.f32 %v800_v54, %v747_v49  ;;  %v890_v56 = vsel %vm885_vm3, %v3200_v53, 0 }
 0x13e   : > { %v2397_v57 = vpop.f32.mrf.mxu1  ;;  %2407 = vmatpush3.bf16.xpose.msra.mxu1 %v890_v56 }
 0x13f   : > { %v3204_v58 = vpack.c.bf16 %v801_v55, %v801_v55  ;;  %2418 = vmatprep.subr.bf16.mxu1 %v2911_v17 }
 0x141   : > { %v936_v59 = vsel %vm885_vm3, %v3204_v58, 0 }
 0x191   : > { %v648_v24 = vpop.xlane.xlu1 %647 }
 0x192   : > { %v652_v25 = vmul.f32 0.03125, %v648_v24 }
 0x194   : > { %v654_v26 = vadd.f32 1e-05, %v652_v25 }
 0x195   : > { %v651_v27 = vpop.xlane.xlu1 %650 }
 0x196   : > { %2667 = vrsqrt.f32 %v654_v26  ;;  %v653_v28 = vmul.f32 0.03125, %v651_v27  ;;  %v3239_v27 = vld [vmem:[#allocation8 + $0x1] ss:$0 sm:$0xff] }
 0x198   : > { %v655_v29 = vadd.f32 1e-05, %v653_v28 }
 0x19a   : > { %2669 = vrsqrt.f32 %v655_v29 }
 0x1a3   : > { %v2668_v34 = vpop.eup %2667 }
 0x1a4   : > { %v658_v35 = vmul.f32 %v2668_v34, %v642_v8 }
 0x1a6   : > { %v664_v40 = vmul.f32 %v663_v36, %v658_v35 }
 0x1a7   : > { %v2670_v38 = vpop.eup %2669 }
 0x1a8   : > { %v659_v39 = vmul.f32 %v2670_v38, %v643_v12  ;;  %v670_v43 = vadd.f32 %v669_v41, %v664_v40 }
 0x1aa   : > { %v665_v42 = vmul.f32 %v663_v36, %v659_v39 }
 0x1ac   : > { %v671_v44 = vadd.f32 %v669_v41, %v665_v42 }
 0x1ae   : > { %v672_v46 = vpack.c.bf16 %v671_v44, %v670_v43 }
 0x1b0   : > { %2387 = vmatmul.mubr.msk.bf16.vlgmr.msra.gmra.mxu0 %vm632_vm1, %v672_v46 }
 0x1b1   : > { %2399 = vmatpush3.bf16.msra.mxu0 %v2657_v45  ;;  %2402 = vmatprep.mubr.msk.bf16.mxu0 %vm2912_vm2, %v2911_v17 }
 0x1b2   : > { %2400 = vmatprep.subr.bf16.mxu0 %v2911_v17 }
 0x1b5   : > { %2401 = vmatpush3.bf16.msra.mxu0 %v2658_v47 }
 0x1b6   : > { %2412 = vmatprep.subr.bf16.mxu0 %v2911_v17 }
 0x1b8   : > { %2403 = vmatmul.mubr.msk.bf16.vlgmr.msra.gmra.mxu0 %vm632_vm1, %v675_v23  ;;  %v3236_v23 = vld [vmem:[#allocation8] ss:$0 sm:$0xff] }
 0x1b9   : > { %2414 = vmatprep.mubr.msk.bf16.mxu0 %vm2912_vm2, %v2911_v17  ;;  %2413 = vmatpush3.bf16.xpose.msra.mxu0 %v936_v59 }
 0x1ba   : > { %2424 = vmatprep.subr.bf16.mxu0 %v2911_v17 }
 0x270   : > { %v733_v62 = vpop.f32.mrf.mxu0 }
 0x271   : > { %v734_v63 = vadd.f32 %v733_v62, %v683_v61 }
 0x272   : > { %v2388_v0 = vpop.f32.mrf.mxu0 }
 0x273   : > { %v865_v1 = vmul.f32 0.35355338, %v734_v63 }
 0x274   : > { %v736_v4 = vpop.f32.mrf.mxu0 }
 0x275   : > { %v3212_v5 = vpack.c.bf16 %v865_v1, %v865_v1  ;;  %v737_v6 = vadd.f32 %v736_v4, %v683_v61 }
 0x276   : > { %v2389_v7 = vpop.f32.mrf.mxu0 }
 0x277   : > { %v866_v8 = vmul.f32 0.35355338, %v737_v6  ;;  %2409 = vmatmul.mubr.msk.bf16.vlgmr.msra.gmra.mxu1 %vm885_vm3, %v3212_v5 }
 0x278   : > { %v858_v9 = vpop.f32.mrf.mxu0  ;;  %2420 = vmatprep.mubr.msk.bf16.mxu1 %vm2912_vm2, %v2911_v17 }
 0x279   : > { %v3218_v10 = vpack.c.bf16 %v866_v8, %v866_v8  ;;  %v859_v16 = vadd.f32 %v858_v9, %v811_v15 }
 0x27a   : > { %v2404_v11 = vpop.f32.mrf.mxu0 }
 0x27b   : > { %2415 = vmatmul.mubr.msk.bf16.vlgmr.msra.gmra.mxu0 %vm885_vm3, %v3218_v10  ;;  %v3226_v19 = vpack.c.bf16 %v859_v16, %v859_v16 }
 0x27c   : > { %v861_v12 = vpop.f32.mrf.mxu0  ;;  %2426 = vmatprep.mubr.msk.bf16.mxu0 %vm2912_vm2, %v2911_v17 }
 0x27d   : > { %v862_v18 = vadd.f32 %v861_v12, %v811_v15  ;;  %v1007_v21 = vsel %vm1005_vm4, %v3226_v19, 0 }
 0x27e   : > { %v2405_v13 = vpop.f32.mrf.mxu0  ;;  %2419 = vmatpush3.bf16.msra.mxu1 %v1007_v21 }
 0x27f   : > { %v3228_v20 = vpack.c.bf16 %v862_v18, %v862_v18  ;;  %2430 = vmatprep.subr.bf16.mxu1 %v2911_v17 }
 0x281   : > { %v1053_v22 = vsel %vm1005_vm4, %v3228_v20, 0 }
 0x282   : > { %2425 = vmatpush3.bf16.msra.mxu0 %v1053_v22 }
 0x283   : > { %2436 = vmatprep.subr.bf16.mxu0 %v2911_v17 }
 0x337   : > { %v926_v24 = vpop.f32.mrf.mxu1 }
 0x338   : > { %v927_v25 = vadd.f32 %v3236_v23, %v926_v24 }
 0x339   : > { %v2410_v26 = vpop.f32.mrf.mxu1 }
 0x33a   : > { %v978_v28 = vsel %vm885_vm3, %v927_v25, -inf }
 0x33b   : > { %979 = vmax.xlane.f32.xlu0 %v978_v28  ;;  %v929_v29 = vpop.f32.mrf.mxu1  ;;  %v972_v30 = vpop.f32.mrf.mxu0 }
 0x33c   : > { %v973_v32 = vadd.f32 %v3239_v27, %v972_v30 }
 0x33d   : > { %v2411_v34 = vpop.f32.mrf.mxu1  ;;  %v2416_v35 = vpop.f32.mrf.mxu0 }
 0x33e   : > { %v981_v36 = vsel %vm885_vm3, %v973_v32, -inf }
 0x33f   : > { %982 = vmax.xlane.f32.xlu1 %v981_v36  ;;  %v975_v37 = vpop.f32.mrf.mxu0 }
 0x341   : > { %v2417_v38 = vpop.f32.mrf.mxu0 }
 0x350   : > { %1151 = vrot.lane.b32.xlu1 %v3204_v58, %s2913_s3 }
 0x3c4   : > { %v980_v39 = vpop.xlane.xlu0 %979 }
 0x3c5   : > { %v984_v40 = vsub.f32 %v927_v25, %v980_v39 }
 0x3c7   : > { %v986_v41 = vmul.f32 1.442695, %v984_v40 }
 0x3c8   : > { %v983_v42 = vpop.xlane.xlu1 %982 }
 0x3c9   : > { %2671 = vpow2.f32 %v986_v41  ;;  %v985_v43 = vsub.f32 %v973_v32, %v983_v42 }
 0x3cb   : > { %v988_v44 = vmul.f32 1.442695, %v985_v43 }
 0x3cc   : > { %v1152_v49 = vpop.permute.xlu1 %1151 }
 0x3cd   : > { %2673 = vpow2.f32 %v988_v44  ;;  %v1157_v62 = vsel %vm885_vm3, %v1152_v49, 0 }
 0x3d6   : > { %v2672_v45 = vpop.eup %2671 }
 0x3d7   : > { %v990_v46 = vsel %vm885_vm3, %v2672_v45, 0.0 }
 0x3d8   : > { %991 = vadd.xlane.f32.xlu0 %v990_v46 }
 0x3da   : > { %v2674_v47 = vpop.eup %2673 }
 0x3db   : > { %v993_v48 = vsel %vm885_vm3, %v2674_v47, 0.0 }
 0x3dc   : > { %994 = vadd.xlane.f32.xlu1 %v993_v48 }
 0x3ed   : > { %1096 = vrot.lane.b32.xlu1 %v3212_v5, %s2913_s3 }
 0x3ee   : > { %1099 = vrot.lane.b32.xlu0 %v3200_v53, %s2913_s3 }
 0x3f1   : > { %1148 = vrot.lane.b32.xlu1 %v3218_v10, %s2913_s3 }
 0x461   : > { %v992_v50 = vpop.xlane.xlu0 %991 }
 0x462   : > { %2675 = vrcp.f32 %v992_v50 }
 0x465   : > { %v995_v51 = vpop.xlane.xlu1 %994  ;;  %v1100_v55 = vpop.permute.xlu0 %1099 }
 0x466   : > { %2677 = vrcp.f32 %v995_v51  ;;  %v1105_v59 = vsel %vm885_vm3, %v1100_v55, 0 }
 0x469   : > { %v1097_v63 = vpop.permute.xlu1 %1096 }
 0x46d   : > { %v1149_v0 = vpop.permute.xlu1 %1148 }
 0x46f   : > { %v2676_v52 = vpop.eup %2675 }
 0x470   : > { %v998_v54 = vmul.f32 %v2676_v52, %v2672_v45 }
 0x472   : > { %v1000_v56 = vpack.c.bf16 %v998_v54, %v998_v54 }
 0x473   : > { %v2678_v57 = vpop.eup %2677 }
 0x474   : > { %2421 = vmatmul.mubr.msk.bf16.vlgmr.msra.gmra.mxu1 %vm885_vm3, %v1000_v56  ;;  %v999_v60 = vmul.f32 %v2678_v57, %v2674_v47 }
 0x475   : > { %2431 = vmatpush3.bf16.xpose.msra.mxu1 %v1105_v59  ;;  %2432 = vmatprep.mubr.msk.bf16.mxu1 %vm2912_vm2, %v2911_v17 }
 0x476   : > { %v1001_v61 = vpack.c.bf16 %v999_v60, %v999_v60  ;;  %2442 = vmatprep.subr.bf16.mxu1 %v2911_v17 }
 0x478   : > { %2427 = vmatmul.mubr.msk.bf16.vlgmr.msra.gmra.mxu0 %vm885_vm3, %v1001_v61 }
 0x479   : > { %2437 = vmatpush3.bf16.xpose.msra.mxu0 %v1157_v62  ;;  %2438 = vmatprep.mubr.msk.bf16.mxu0 %vm2912_vm2, %v2911_v17 }
 0x47a   : > { %2448 = vmatprep.subr.bf16.mxu0 %v2911_v17 }
 0x47c   : > { %2433 = vmatmul.mubr.msk.bf16.vlgmr.msra.gmra.mxu1 %vm885_vm3, %v1097_v63 }
 0x47d   : > { %2444 = vmatprep.mubr.msk.bf16.mxu1 %vm2912_vm2, %v2911_v17 }
 0x480   : > { %2439 = vmatmul.mubr.msk.bf16.vlgmr.msra.gmra.mxu0 %vm885_vm3, %v1149_v0 }
 0x481   : > { %2450 = vmatprep.mubr.msk.bf16.mxu0 %vm2912_vm2, %v2911_v17 }
 0x534   : > { %v3270_v1 = vpop.f32.mrf.mxu1 }
 0x536   : > { %v2422_v4 = vpop.f32.mrf.mxu1 }
 0x538   : > { %v1046_v6 = vpop.f32.mrf.mxu1  ;;  %v3272_v7 = vpop.f32.mrf.mxu0 }
 0x53a   : > { %v2423_v8 = vpop.f32.mrf.mxu1  ;;  %v2428_v9 = vpop.f32.mrf.mxu0 }
 0x53c   : > { %v1092_v11 = vpop.f32.mrf.mxu0  ;;  %v1141_v12 = vpop.f32.mrf.mxu1 }
 0x53d   : > { %v1142_v13 = vadd.f32 %v3236_v23, %v1141_v12 }
 0x53e   : > { %v2429_v14 = vpop.f32.mrf.mxu0  ;;  %v2434_v15 = vpop.f32.mrf.mxu1 }
 0x53f   : > { %v1199_v16 = vsel %vm885_vm3, %v1142_v13, -inf }
 0x540   : > { %1200 = vmax.xlane.f32.xlu0 %v1199_v16  ;;  %v1144_v18 = vpop.f32.mrf.mxu1  ;;  %v1193_v21 = vpop.f32.mrf.mxu0 }
 0x541   : > { %v1194_v22 = vadd.f32 %v3239_v27, %v1193_v21 }
 0x542   : > { %v2435_v24 = vpop.f32.mrf.mxu1  ;;  %v2440_v25 = vpop.f32.mrf.mxu0 }
 0x543   : > { %v1202_v26 = vsel %vm885_vm3, %v1194_v22, -inf }
 0x544   : > { %1203 = vmax.xlane.f32.xlu1 %v1202_v26  ;;  %v1196_v28 = vpop.f32.mrf.mxu0 }
 0x546   : > { %v2441_v29 = vpop.f32.mrf.mxu0 }
 0x555   : > { %1273 = vrot.lane.b32.xlu1 %v3228_v20, %s2913_s3 }
 0x559   : > { %1323 = vrot.lane.b32.xlu1 %v3200_v53, %s2914_s4 }
 0x55d   : > { %1373 = vrot.lane.b32.xlu1 %v3204_v58, %s2914_s4 }
 0x561   : > { %1371 = vrot.lane.b32.xlu1 %v3218_v10, %s2914_s4 }
 0x5c9   : > { %v1201_v30 = vpop.xlane.xlu0 %1200 }
 0x5ca   : > { %v1205_v32 = vsub.f32 %v1142_v13, %v1201_v30 }
 0x5cc   : > { %v1207_v34 = vmul.f32 1.442695, %v1205_v32 }
 0x5cd   : > { %v1204_v35 = vpop.xlane.xlu1 %1203 }
 0x5ce   : > { %2679 = vpow2.f32 %v1207_v34  ;;  %v1206_v36 = vsub.f32 %v1194_v22, %v1204_v35 }
 0x5d0   : > { %v1209_v37 = vmul.f32 1.442695, %v1206_v36 }
 0x5d1   : > { %v1274_v38 = vpop.permute.xlu1 %1273 }
 0x5d2   : > { %2681 = vpow2.f32 %v1209_v37  ;;  %v1279_v39 = vsel %vm1005_vm4, %v1274_v38, 0 }
 0x5d3   : > { %2449 = vmatpush3.bf16.msra.mxu0 %v1279_v39 }
 0x5d4   : > { %2460 = vmatprep.subr.bf16.mxu0 %v2911_v17 }
 0x5d5   : > { %v1324_v49 = vpop.permute.xlu1 %1323 }
 0x5d6   : > { %v1329_v54 = vsel %vm885_vm3, %v1324_v49, 0 }
 0x5d9   : > { %v1374_v56 = vpop.permute.xlu1 %1373 }
 0x5da   : > { %v1379_v59 = vsel %vm885_vm3, %v1374_v56, 0 }
 0x5db   : > { %v2680_v40 = vpop.eup %2679 }
 0x5dc   : > { %v1211_v41 = vsel %vm885_vm3, %v2680_v40, 0.0 }
 0x5dd   : > { %1212 = vadd.xlane.f32.xlu0 %v1211_v41  ;;  %v1372_v61 = vpop.permute.xlu1 %1371 }
 0x5df   : > { %v2682_v42 = vpop.eup %2681 }
 0x5e0   : > { %v1214_v43 = vsel %vm885_vm3, %v2682_v42, 0.0 }
 0x5e1   : > { %1215 = vadd.xlane.f32.xlu0 %v1214_v43 }
 0x5f7   : > { %1224 = vrot.lane.b32.xlu0 %v3226_v19, %s2913_s3 }
 0x5fb   : > { %1321 = vrot.lane.b32.xlu0 %v3212_v5, %s2914_s4 }
 0x666   : > { %v1213_v44 = vpop.xlane.xlu0 %1212 }
 0x667   : > { %2683 = vrcp.f32 %v1213_v44 }
 0x66a   : > { %v1216_v45 = vpop.xlane.xlu0 %1215 }
 0x66b   : > { %2685 = vrcp.f32 %v1216_v45 }
 0x66e   : > { %v1225_v46 = vpop.permute.xlu0 %1224 }
 0x66f   : > { %v1230_v47 = vsel %vm1005_vm4, %v1225_v46, 0 }
 0x670   : > { %2443 = vmatpush3.bf16.msra.mxu1 %v1230_v47 }
 0x671   : > { %2454 = vmatprep.subr.bf16.mxu1 %v2911_v17 }
 0x672   : > { %v1322_v60 = vpop.permute.xlu0 %1321 }
 0x674   : > { %v2684_v48 = vpop.eup %2683 }
 0x675   : > { %v1219_v50 = vmul.f32 %v2684_v48, %v2680_v40 }
 0x677   : > { %v1221_v51 = vpack.c.bf16 %v1219_v50, %v1219_v50 }
 0x678   : > { %v2686_v52 = vpop.eup %2685 }
 0x679   : > { %2445 = vmatmul.mubr.msk.bf16.vlgmr.msra.gmra.mxu1 %vm885_vm3, %v1221_v51  ;;  %v1220_v55 = vmul.f32 %v2686_v52, %v2682_v42 }
 0x67a   : > { %2455 = vmatpush3.bf16.xpose.msra.mxu1 %v1329_v54  ;;  %2456 = vmatprep.mubr.msk.bf16.mxu1 %vm2912_vm2, %v2911_v17 }
 0x67b   : > { %v1222_v57 = vpack.c.bf16 %v1220_v55, %v1220_v55  ;;  %2466 = vmatprep.subr.bf16.mxu1 %v2911_v17 }
 0x67d   : > { %2451 = vmatmul.mubr.msk.bf16.vlgmr.msra.gmra.mxu0 %vm885_vm3, %v1222_v57 }
 0x67e   : > { %2461 = vmatpush3.bf16.xpose.msra.mxu0 %v1379_v59  ;;  %2462 = vmatprep.mubr.msk.bf16.mxu0 %vm2912_vm2, %v2911_v17 }
 0x67f   : > { %2472 = vmatprep.subr.bf16.mxu0 %v2911_v17 }
 0x681   : > { %2457 = vmatmul.mubr.msk.bf16.vlgmr.msra.gmra.mxu1 %vm885_vm3, %v1322_v60 }
 0x682   : > { %2468 = vmatprep.mubr.msk.bf16.mxu1 %vm2912_vm2, %v2911_v17 }
 0x685   : > { %2463 = vmatmul.mubr.msk.bf16.vlgmr.msra.gmra.mxu0 %vm885_vm3, %v1372_v61 }
 0x686   : > { %2474 = vmatprep.mubr.msk.bf16.mxu0 %vm2912_vm2, %v2911_v17 }
 0x739   : > { %v3312_v62 = vpop.f32.mrf.mxu1 }
 0x73b   : > { %v2446_v63 = vpop.f32.mrf.mxu1 }
 0x73d   : > { %v1269_v0 = vpop.f32.mrf.mxu1  ;;  %v3314_v4 = vpop.f32.mrf.mxu0 }
 0x73e   : > { %v2638_v6 = vpack.i.bf16 %v3314_v4, %v3312_v62 }
 0x73f   : > { %v2447_v8 = vpop.f32.mrf.mxu1  ;;  %v2452_v9 = vpop.f32.mrf.mxu0 }
 0x741   : > { %v1318_v11 = vpop.f32.mrf.mxu0  ;;  %v1365_v12 = vpop.f32.mrf.mxu1 }
 0x742   : > { %v1366_v13 = vadd.f32 %v3236_v23, %v1365_v12 }
 0x743   : > { %v2453_v14 = vpop.f32.mrf.mxu0  ;;  %v2458_v15 = vpop.f32.mrf.mxu1 }
 0x744   : > { %v1421_v16 = vsel %vm885_vm3, %v1366_v13, -inf }
 0x745   : > { %1422 = vmax.xlane.f32.xlu0 %v1421_v16  ;;  %v1368_v18 = vpop.f32.mrf.mxu1  ;;  %v1415_v21 = vpop.f32.mrf.mxu0 }
 0x746   : > { %v1416_v22 = vadd.f32 %v3239_v27, %v1415_v21 }
 0x747   : > { %v2459_v24 = vpop.f32.mrf.mxu1  ;;  %v2464_v25 = vpop.f32.mrf.mxu0 }
 0x748   : > { %v1424_v26 = vsel %vm885_vm3, %v1416_v22, -inf }
 0x749   : > { %1425 = vmax.xlane.f32.xlu1 %v1424_v26  ;;  %v1418_v28 = vpop.f32.mrf.mxu0 }
 0x74b   : > { %v2465_v29 = vpop.f32.mrf.mxu0 }
 0x75a   : > { %1493 = vrot.lane.b32.xlu1 %v3228_v20, %s2914_s4 }
 0x75e   : > { %1543 = vrot.lane.b32.xlu1 %v3200_v53, %s2915_s7 }
 0x762   : > { %1593 = vrot.lane.b32.xlu1 %v3204_v58, %s2915_s7 }
 0x766   : > { %1591 = vrot.lane.b32.xlu1 %v3218_v10, %s2915_s7 }
 0x7ce   : > { %v1423_v30 = vpop.xlane.xlu0 %1422 }
 0x7cf   : > { %v1427_v32 = vsub.f32 %v1366_v13, %v1423_v30 }
 0x7d1   : > { %v1429_v34 = vmul.f32 1.442695, %v1427_v32 }
 0x7d2   : > { %v1426_v35 = vpop.xlane.xlu1 %1425 }
 0x7d3   : > { %2687 = vpow2.f32 %v1429_v34  ;;  %v1428_v36 = vsub.f32 %v1416_v22, %v1426_v35 }
 0x7d5   : > { %v1431_v37 = vmul.f32 1.442695, %v1428_v36 }
 0x7d6   : > { %v1494_v38 = vpop.permute.xlu1 %1493 }
 0x7d7   : > { %2689 = vpow2.f32 %v1431_v37  ;;  %v1499_v39 = vsel %vm1005_vm4, %v1494_v38, 0 }
 0x7d8   : > { %2473 = vmatpush3.bf16.msra.mxu0 %v1499_v39 }
 0x7d9   : > { %2484 = vmatprep.subr.bf16.mxu0 %v2911_v17 }
 0x7da   : > { %v1544_v46 = vpop.permute.xlu1 %1543 }
 0x7db   : > { %v1549_v50 = vsel %vm885_vm3, %v1544_v46, 0 }
 0x7de   : > { %v1594_v51 = vpop.permute.xlu1 %1593 }
 0x7df   : > { %v1599_v54 = vsel %vm885_vm3, %v1594_v51, 0 }
 0x7e0   : > { %v2688_v53 = vpop.eup %2687 }
 0x7e1   : > { %v1433_v58 = vsel %vm885_vm3, %v2688_v53, 0.0 }
 0x7e2   : > { %1434 = vadd.xlane.f32.xlu0 %v1433_v58  ;;  %v1592_v56 = vpop.permute.xlu1 %1591 }
 0x7e4   : > { %v2690_v40 = vpop.eup %2689 }
 0x7e5   : > { %v1436_v10 = vsel %vm885_vm3, %v2690_v40, 0.0 }
 0x7e6   : > { %1437 = vadd.xlane.f32.xlu0 %v1436_v10 }
 0x7fc   : > { %1445 = vrot.lane.b32.xlu0 %v3226_v19, %s2914_s4 }
 0x800   : > { %1541 = vrot.lane.b32.xlu0 %v3212_v5, %s2915_s7 }
 0x86b   : > { %v1435_v41 = vpop.xlane.xlu0 %1434 }
 0x86c   : > { %2691 = vrcp.f32 %v1435_v41 }
 0x86f   : > { %v1438_v42 = vpop.xlane.xlu0 %1437 }
 0x870   : > { %2693 = vrcp.f32 %v1438_v42 }
 0x873   : > { %v1446_v43 = vpop.permute.xlu0 %1445 }
 0x874   : > { %v1451_v44 = vsel %vm1005_vm4, %v1446_v43, 0  ;;  %v2659_v43 = vld [vmem:[%s3133_s2 + $0x8] sm:$0xff]  }
 0x875   : > { %2467 = vmatpush3.bf16.msra.mxu1 %v1451_v44  ;;  %v2660_v44 = vld [vmem:[%s3133_s2] sm:$0xff]   ;;  %s3511_s2 = scalar_lea.vmem [#allocation9], %s3102_s0 }
 0x876   : > { %2478 = vmatprep.subr.bf16.mxu1 %v2911_v17  ;;  %s3512_s11 = smov %s3511_s2 }
 0x877   : > { %v1542_v55 = vpop.permute.xlu0 %1541 }
 0x879   : > { %v2692_v45 = vpop.eup %2691 }
 0x87a   : > { %v1441_v47 = vmul.f32 %v2692_v45, %v2688_v53 }
 0x87c   : > { %v1443_v48 = vpack.c.bf16 %v1441_v47, %v1441_v47 }
 0x87d   : > { %v2694_v49 = vpop.eup %2693 }
 0x87e   : > { %2469 = vmatmul.mubr.msk.bf16.vlgmr.msra.gmra.mxu1 %vm885_vm3, %v1443_v48  ;;  %v1442_v5 = vmul.f32 %v2694_v49, %v2690_v40 }
 0x87f   : > { %2479 = vmatpush3.bf16.xpose.msra.mxu1 %v1549_v50  ;;  %2480 = vmatprep.mubr.msk.bf16.mxu1 %vm2912_vm2, %v2911_v17 }
 0x880   : > { %v1444_v52 = vpack.c.bf16 %v1442_v5, %v1442_v5  ;;  %2490 = vmatprep.subr.bf16.mxu1 %v2911_v17 }
 0x882   : > { %2475 = vmatmul.mubr.msk.bf16.vlgmr.msra.gmra.mxu0 %vm885_vm3, %v1444_v52 }
 0x883   : > { %2485 = vmatpush3.bf16.xpose.msra.mxu0 %v1599_v54  ;;  %2486 = vmatprep.mubr.msk.bf16.mxu0 %vm2912_vm2, %v2911_v17 }
 0x884   : > { %2496 = vmatprep.subr.bf16.mxu0 %v2911_v17 }
 0x886   : > { %2481 = vmatmul.mubr.msk.bf16.vlgmr.msra.gmra.mxu1 %vm885_vm3, %v1542_v55 }
 0x887   : > { %2492 = vmatprep.mubr.msk.bf16.mxu1 %vm2912_vm2, %v2911_v17 }
 0x88a   : > { %2487 = vmatmul.mubr.msk.bf16.vlgmr.msra.gmra.mxu0 %vm885_vm3, %v1592_v56 }
 0x88b   : > { %2498 = vmatprep.mubr.msk.bf16.mxu0 %vm2912_vm2, %v2911_v17 }
 0x93e   : > { %v1487_v57 = vpop.f32.mrf.mxu1 }
 0x940   : > { %v2470_v59 = vpop.f32.mrf.mxu1 }
 0x942   : > { %v1490_v60 = vpop.f32.mrf.mxu1  ;;  %v1535_v61 = vpop.f32.mrf.mxu0 }
 0x944   : > { %v2471_v63 = vpop.f32.mrf.mxu1  ;;  %v2476_v0 = vpop.f32.mrf.mxu0 }
 0x946   : > { %v1538_v8 = vpop.f32.mrf.mxu0  ;;  %v1585_v9 = vpop.f32.mrf.mxu1 }
 0x947   : > { %v1586_v11 = vadd.f32 %v3236_v23, %v1585_v9  ;;  %v2643_v23 = vpack.i.bf16 %v1535_v61, %v1487_v57 }
 0x948   : > { %v2477_v12 = vpop.f32.mrf.mxu0  ;;  %v2482_v13 = vpop.f32.mrf.mxu1 }
 0x949   : > { %v1641_v14 = vsel %vm885_vm3, %v1586_v11, -inf }
 0x94a   : > { %1642 = vmax.xlane.f32.xlu0 %v1641_v14  ;;  %v1588_v15 = vpop.f32.mrf.mxu1  ;;  %v1635_v16 = vpop.f32.mrf.mxu0 }
 0x94b   : > { %v1636_v18 = vadd.f32 %v3239_v27, %v1635_v16  ;;  %v1800_v16 = vsub.s32 5, %v3179_v31 }
 0x94c   : > { %v2483_v21 = vpop.f32.mrf.mxu1  ;;  %v2488_v22 = vpop.f32.mrf.mxu0 }
 0x94d   : > { %v1644_v24 = vsel %vm885_vm3, %v1636_v18, -inf }
 0x94e   : > { %1645 = vmax.xlane.f32.xlu1 %v1644_v24  ;;  %v1638_v25 = vpop.f32.mrf.mxu0 }
 0x950   : > { %v2489_v26 = vpop.f32.mrf.mxu0 }
 0x95f   : > { %1713 = vrot.lane.b32.xlu1 %v3228_v20, %s2915_s7 }
 0x963   : > { %2639 = vrot.lane.b32.xlu1 %v2638_v6, %s2916_s16 }
 0x967   : > { %2644 = vrot.lane.b32.xlu1 %v2643_v23, %s2917_s26 }
 0x9d3   : > { %v1643_v27 = vpop.xlane.xlu0 %1642 }
 0x9d4   : > { %v1647_v28 = vsub.f32 %v1586_v11, %v1643_v27 }
 0x9d6   : > { %v1649_v29 = vmul.f32 1.442695, %v1647_v28 }
 0x9d7   : > { %v1646_v30 = vpop.xlane.xlu1 %1645 }
 0x9d8   : > { %2695 = vpow2.f32 %v1649_v29  ;;  %v1648_v32 = vsub.f32 %v1636_v18, %v1646_v30  ;;  %v1801_v18 = vrot.slane %v3183_v33, %v1800_v16 }
 0x9da   : > { %v1651_v34 = vmul.f32 1.442695, %v1648_v32 }
 0x9db   : > { %v1714_v35 = vpop.permute.xlu1 %1713 }
 0x9dc   : > { %2697 = vpow2.f32 %v1651_v34  ;;  %v1719_v20 = vsel %vm1005_vm4, %v1714_v35, 0 }
 0x9dd   : > { %2497 = vmatpush3.bf16.msra.mxu0 %v1719_v20 }
 0x9de   : > { %2510 = vmatprep.subr.bf16.mxu0 %v2911_v17 }
 0x9df   : > { %v2640_v54 = vpop.permute.xlu1 %2639 }
 0x9e0   : > { %v2642_v56 = vunpack.i.h.bf16 %v2640_v54  ;;  %v2641_v57 = vunpack.i.l.bf16 %v2640_v54  ;;  %v2665_v54 = vld [vmem:[%s3138_s14 + $0x8] sm:$0xff]  }
 0x9e2   : > { %v1786_v63 = vsel %vm885_vm3, %v3272_v7, %v2642_v56  ;;  %v1785_v0 = vsel %vm885_vm3, %v3270_v1, %v2641_v57 }
 0x9e3   : > { %v2645_v55 = vpop.permute.xlu1 %2644 }
 0x9e4   : > { %v2647_v59 = vunpack.i.h.bf16 %v2645_v55  ;;  %v2646_v60 = vunpack.i.l.bf16 %v2645_v55 }
 0x9e5   : > { %v2696_v36 = vpop.eup %2695 }
 0x9e6   : > { %v1653_v62 = vsel %vm885_vm3, %v2696_v36, 0.0  ;;  %v1788_v11 = vsel %vm1787_vm5, %v1785_v0, %v2646_v60  ;;  %v1789_v12 = vsel %vm1787_vm5, %v1786_v63, %v2647_v59 }
 0x9e7   : > { %1654 = vadd.xlane.f32.xlu0 %v1653_v62 }
 0x9e9   : > { %v2698_v4 = vpop.eup %2697 }
 0x9ea   : > { %v1656_v6 = vsel %vm885_vm3, %v2698_v4, 0.0 }
 0x9eb   : > { %1657 = vadd.xlane.f32.xlu0 %v1656_v6  ;;  %v2662_v6 = vld [vmem:[%s3512_s11] sm:$0xff]  }
 0xa01   : > { %1665 = vrot.lane.b32.xlu0 %v3226_v19, %s2915_s7 }
 0xa70   : > { %v1655_v37 = vpop.xlane.xlu0 %1654 }
 0xa71   : > { %2699 = vrcp.f32 %v1655_v37  ;;  %v2663_v37 = vld [vmem:[%s3138_s14 + $0x18] sm:$0xff]  }
 0xa74   : > { %v1658_v38 = vpop.xlane.xlu0 %1657 }
 0xa75   : > { %2701 = vrcp.f32 %v1658_v38 }
 0xa78   : > { %v1666_v39 = vpop.permute.xlu0 %1665 }
 0xa79   : > { %v1671_v53 = vsel %vm1005_vm4, %v1666_v39, 0 }
 0xa7a   : > { %2491 = vmatpush3.bf16.msra.mxu1 %v1671_v53 }
 0xa7b   : > { %2502 = vmatprep.subr.bf16.mxu1 %v2911_v17 }
 0xa7e   : > { %v2700_v58 = vpop.eup %2699 }
 0xa7f   : > { %v1661_v40 = vmul.f32 %v2700_v58, %v2696_v36 }
 0xa81   : > { %v1663_v10 = vpack.c.bf16 %v1661_v40, %v1661_v40 }
 0xa82   : > { %v2702_v41 = vpop.eup %2701 }
 0xa83   : > { %2493 = vmatmul.mubr.msk.bf16.vlgmr.msra.gmra.mxu1 %vm885_vm3, %v1663_v10  ;;  %v1662_v42 = vmul.f32 %v2702_v41, %v2698_v4  ;;  %v2661_v4 = vld [vmem:[%s3511_s2 + $0x8] sm:$0xff]   ;;  %v1888_v41 = vsub.s32 6, %v3179_v31 }
 0xa84   : > { %2506 = vmatprep.mubr.msk.bf16.mxu1 %vm2912_vm2, %v2911_v17  ;;  %2503 = vmatpush3.bf16.msra.mxu1 %v2659_v43 }
 0xa85   : > { %v1664_v19 = vpack.c.bf16 %v1662_v42, %v1662_v42  ;;  %2504 = vmatprep.subr.bf16.mxu1 %v2911_v17  ;;  %v1889_v43 = vrot.slane %v3183_v33, %v1888_v41 }
 0xa87   : > { %2499 = vmatmul.mubr.msk.bf16.vlgmr.msra.gmra.mxu0 %vm885_vm3, %v1664_v19 }
 0xa88   : > { %2514 = vmatprep.mubr.msk.bf16.mxu0 %vm2912_vm2, %v2911_v17  ;;  %2505 = vmatpush3.bf16.msra.mxu1 %v2660_v44  ;;  %v1894_v44 = vsub.s32 7, %v3179_v31  ;;  %v2666_v31 = vld [vmem:[%s3138_s14] sm:$0xff]  }
 0xa89   : > { %2518 = vmatprep.subr.bf16.mxu1 %v2911_v17  ;;  %2511 = vmatpush3.bf16.msra.mxu0 %v2661_v4 }
 0xa8a   : > { %2512 = vmatprep.subr.bf16.mxu0 %v2911_v17 }
 0xa8d   : > { %2513 = vmatpush3.bf16.msra.mxu0 %v2662_v6 }
 0xb43   : > { %v1707_v45 = vpop.f32.mrf.mxu1 }
 0xb45   : > { %v2494_v46 = vpop.f32.mrf.mxu1 }
 0xb47   : > { %v1710_v47 = vpop.f32.mrf.mxu1  ;;  %v1755_v48 = vpop.f32.mrf.mxu0 }
 0xb48   : > { %v2648_v49 = vpack.i.bf16 %v1755_v48, %v1707_v45  ;;  %v1895_v48 = vrot.slane %v3183_v33, %v1894_v44  ;;  %v2308_v33 = vld [vmem:[%s614_s29] ss:$0 sm:$0xff] }
 0xb49   : > { %v2495_v50 = vpop.f32.mrf.mxu1  ;;  %v2500_v5 = vpop.f32.mrf.mxu0 }
 0xb4a   : > { %2649 = vrot.lane.b32.xlu0 %v2648_v49, %s2918_s24 }
 0xb4b   : > { %v1758_v51 = vpop.f32.mrf.mxu0 }
 0xb4d   : > { %v2501_v52 = vpop.f32.mrf.mxu0 }
 0xb4e   : > { %v2664_v52 = vld [vmem:[%s3138_s14 + $0x10] sm:$0xff]  }
 0xbbc   : > { %v2650_v61 = vpop.permute.xlu0 %2649 }
 0xbbd   : > { %v2652_v8 = vunpack.i.h.bf16 %v2650_v61  ;;  %v2651_v9 = vunpack.i.l.bf16 %v2650_v61 }
 0xbbf   : > { %v1792_v13 = vsel %vm1790_vm6, %v1789_v12, %v2652_v8  ;;  %v1791_v14 = vsel %vm1790_vm6, %v1788_v11, %v2651_v9  ;;  %v2312_v9 = vld [vmem:[%s3143_s13 + $0x8] ss:$0 sm:$0xff] }
 0xbc0   : > { %v1793_v15 = vpack.c.bf16 %v1792_v13, %v1791_v14 }
 0xbc2   : > { %2507 = vmatmul.mubr.msk.bf16.vlgmr.msra.gmra.mxu1 %vm632_vm1, %v1793_v15 }
 0xbc3   : > { %2526 = vmatprep.mubr.msk.bf16.mxu1 %vm2912_vm2, %v2911_v17  ;;  %2519 = vmatpush3.bf16.msra.mxu1 %v2663_v37 }
 0xbc4   : > { %2520 = vmatprep.subr.bf16.mxu1 %v2911_v17 }
 0xbc7   : > { %2521 = vmatpush3.bf16.msra.mxu1 %v2664_v52 }
 0xbc8   : > { %2522 = vmatprep.subr.bf16.mxu1 %v2911_v17 }
 0xbcb   : > { %2523 = vmatpush3.bf16.msra.mxu1 %v2665_v54 }
 0xbcc   : > { %2524 = vmatprep.subr.bf16.mxu1 %v2911_v17 }
 0xbcf   : > { %2525 = vmatpush3.bf16.msra.mxu1 %v2666_v31 }
 0xc82   : > { %v1851_v7 = vpop.f32.mrf.mxu1 }
 0xc83   : > { %v1852_v21 = vadd.f32 %v1851_v7, %v1801_v18 }
 0xc84   : > { %v2508_v22 = vpop.f32.mrf.mxu1 }
 0xc85   : > { %v3394_v1 = vadd.f32 %v1852_v21, %v3150_v2 }
 0xc86   : > { %v1854_v24 = vpop.f32.mrf.mxu1 }
 0xc87   : > { %v1855_v25 = vadd.f32 %v1854_v24, %v1801_v18  ;;  %v1860_v26 = vsel %vm632_vm1, %v3394_v1, 0.0 }
 0xc88   : > { %1861 = vadd.xlane.f32.xlu1 %v1860_v26  ;;  %v2509_v23 = vpop.f32.mrf.mxu1 }
 0xc89   : > { %v3399_v27 = vadd.f32 %v1855_v25, %v3152_v3 }
 0xc8b   : > { %v1863_v28 = vsel %vm632_vm1, %v3399_v27, 0.0 }
 0xc8c   : > { %1864 = vadd.xlane.f32.xlu0 %v1863_v28 }
 0xd11   : > { %v1862_v29 = vpop.xlane.xlu1 %1861 }
 0xd12   : > { %v1866_v30 = vmul.f32 0.03125, %v1862_v29 }
 0xd14   : > { %v1868_v2 = vsub.f32 %v3394_v1, %v1866_v30 }
 0xd15   : > { %v1865_v32 = vpop.xlane.xlu0 %1864 }
 0xd16   : > { %v1867_v34 = vmul.f32 0.03125, %v1865_v32  ;;  %v1870_v35 = vmul.f32 %v1868_v2, %v1868_v2 }
 0xd18   : > { %v1869_v20 = vsub.f32 %v3399_v27, %v1867_v34  ;;  %v1872_v36 = vsel %vm632_vm1, %v1870_v35, 0.0 }
 0xd19   : > { %1873 = vadd.xlane.f32.xlu0 %v1872_v36 }
 0xd1a   : > { %v1871_v3 = vmul.f32 %v1869_v20, %v1869_v20 }
 0xd1c   : > { %v1875_v62 = vsel %vm632_vm1, %v1871_v3, 0.0 }
 0xd1d   : > { %1876 = vadd.xlane.f32.xlu0 %v1875_v62 }
 0xda2   : > { %v1874_v38 = vpop.xlane.xlu0 %1873 }
 0xda3   : > { %v1878_v39 = vmul.f32 0.03125, %v1874_v38 }
 0xda5   : > { %v1880_v53 = vadd.f32 1e-05, %v1878_v39 }
 0xda6   : > { %v1877_v58 = vpop.xlane.xlu0 %1876 }
 0xda7   : > { %2703 = vrsqrt.f32 %v1880_v53  ;;  %v1879_v40 = vmul.f32 0.03125, %v1877_v58 }
 0xda9   : > { %v1881_v10 = vadd.f32 1e-05, %v1879_v40 }
 0xdab   : > { %2705 = vrsqrt.f32 %v1881_v10 }
 0xdb4   : > { %v2704_v42 = vpop.eup %2703 }
 0xdb5   : > { %v1884_v19 = vmul.f32 %v2704_v42, %v1868_v2 }
 0xdb7   : > { %v1890_v47 = vmul.f32 %v1889_v43, %v1884_v19 }
 0xdb8   : > { %v2706_v45 = vpop.eup %2705 }
 0xdb9   : > { %v1885_v46 = vmul.f32 %v2706_v45, %v1869_v20  ;;  %v1896_v50 = vadd.f32 %v1895_v48, %v1890_v47 }
 0xdbb   : > { %v1891_v49 = vmul.f32 %v1889_v43, %v1885_v46 }
 0xdbd   : > { %v1897_v5 = vadd.f32 %v1895_v48, %v1891_v49 }
 0xdbf   : > { %v1898_v51 = vpack.c.bf16 %v1897_v5, %v1896_v50 }
 0xdc1   : > { %2515 = vmatmul.mubr.msk.bf16.vlgmr.msra.gmra.mxu0 %vm632_vm1, %v1898_v51 }
 0xe81   : > { %v1959_v55 = vpop.f32.mrf.mxu0 }
 0xe82   : > { %v1960_v57 = vadd.f32 %v2308_v33, %v1959_v55 }
 0xe83   : > { %v2516_v56 = vpop.f32.mrf.mxu0 }
 0xe84   : > { %v1966_v63 = vmax.f32 %v1960_v57, 0.0 }
 0xe85   : > { %v1962_v59 = vpop.f32.mrf.mxu0 }
 0xe86   : > { %v1963_v60 = vadd.f32 %v2308_v33, %v1962_v59 }
 0xe87   : > { %v2517_v61 = vpop.f32.mrf.mxu0 }
 0xe88   : > { %v1967_v0 = vmax.f32 %v1963_v60, 0.0 }
 0xe8a   : > { %v1968_v8 = vpack.c.bf16 %v1967_v0, %v1966_v63 }
 0xe8c   : > { %2527 = vmatmul.mubr.msk.bf16.vlgmr.msra.gmra.mxu1 %vm2005_vm7, %v1968_v8 }
 0xf4c   : > { %v2043_v17 = vpop.f32.mrf.mxu1 }
 0xf4d   : > { %v2044_v11 = vadd.f32 %v2312_v9, %v2043_v17 }
 0xf4e   : > { %v2528_v12 = vpop.f32.mrf.mxu1 }
 0xf4f   : > { %v2050_v13 = vadd.f32 %v2044_v11, %v3394_v1 }
 0xf50   : > { %v2046_v14 = vpop.f32.mrf.mxu1 }
 0xf51   : > { %2052 = vst.msk [vmem:[#allocation2] sm:$0xff] %vm632_vm1, %v2050_v13  ;;  %v2047_v15 = vadd.f32 %v2312_v9, %v2046_v14  ;;  %2057 = sbr.rel (%p2318_p12) target bundleno = 3927 (0xf57), region = 88 }
 0xf52   : > { %v2529_v16 = vpop.f32.mrf.mxu1 }
 0xf53   : > { %v2051_v18 = vadd.f32 %v2047_v15, %v3399_v27 }
 0xf55   : > { %2053 = vst.msk [vmem:[#allocation2 + $0x8] sm:$0xff] %vm632_vm1, %v2051_v18 }
 0xf56   : > { %2058 = vst.msk [vmem:[#allocation11] sm:$0xff] %vm632_vm1, %v2050_v13  ;;  %2059 = vst.msk [vmem:[#allocation11 + $0x8] sm:$0xff] %vm632_vm1, %v2051_v18 }
 0xf57 PF: > { %s3513_s12 = sadd.s32 4294967295, %s2899_s22   ;;  %s2919_s23 = smov [#allocation11]  }
 0xf58   : > { %p3439_p7 = scmp.eq.s32.totalorder %s3513_s12, 1  ;;  %s2069_s17 = sshll.u32 %s2919_s23, 4  ;;  %s2070_s17 = int_to_ptr.vmem [resolvable:$true] %s2069_s17 }
 0xf59   : > { %s2813_s1 = scalar_lea.vmem %s2070_s17, 256  ;;  %p2820_p3 = scmp.lt.s32.totalorder %s2070_s17, %s2070_s17 }
 0xf5a   : > { %p2814_p13 = scmp.ne.s32.totalorder %s2070_s17, %s2813_s1  ;;  %p2821_p6 = scmp.lt.s32.totalorder %s2813_s1, %s2813_s1 }
 0xf5c   : > { %p2815_p0 = pnand %p2814_p13, %p3439_p7  ;;  %p2822_p10 = por %p2821_p6, %p2820_p3 }
 0xf5e   : > { %p2816_p2 = pneg %p2815_p0 }
 0xf60   : > { %p2823_p1 = pnand %p2822_p10, %p2816_p2 }
 0xf62   : > { %2826 = shalt.err (!%p2823_p1)
}
 0xf63   : > { %s2920_s20 = smov 128   ;;  %s3515_s13 = sld [smem:[#allocation23_spill]] }
 0xf69   : > { %2545 = dma.vmem_to_hbm [thread:$0]  (%p3439_p7), %s2070_s17, 256, %s3515_s13, [#allocation5], %s2920_s20, %s2920_s20, %s2916_s16  }
 0xf6a   : > { %2874 = dma.done.wait (%p3439_p7), [#allocation5], 256  }
 0xf6b   : > { %2876 = vsyncadd (%p3439_p7), [#allocation5], 4294967040 }
 0xf6c PF: > { %s27_s22 = sadd.s32 1, %s2899_s22   ;;  %s3516_s28 = sld [smem:[#allocation16_spill]] }
 0xf6d   : > { %p24_p4 = scmp.ge.s32.totalorder %s27_s22, 4   ;;  %s3517_s17 = smov %s2883_s18 }
 0xf6e   : > { %s3518_s18 = smov %s2887_s19  ;;  %s3519_s19 = smov %s3076_s30 }
 0xf6f   : > { %s3520_s20 = smov %s2895_s21  ;;  %26 = sbr.rel (!%p24_p4) target bundleno = 15 (0xf), region = 147 }
 0xf72   : > { %s3521_s21 = smov %s3516_s28 }
 0xf74   :  { %2085 = vsyncpa [#allocation4], 1 }
 0xf75   :  { %2087 = vsyncpa [#allocation4 + $0x1], 1 }
 0xf76   :  { %2088 = vsyncpa [#allocation7], 1 }
 0xf77   :  { %2089 = vsyncpa [#allocation10], 1 }
 0xf78   :  { %2091 = vsyncpa [#allocation10 + $0x1], 1 }
 0xf79   :  { %2092 = vsyncpa [#allocation5], 1 }
 0xf7a   :  { %2094 = vsyncpa [#allocation5 + $0x1], 1 }

</bundles_post_ra>
